<compile_context>
chip_gen: v7x
topology: tpu7x:2x2x1
jax: 0.10.0
libtpu: 0.0.40
codegen_flags: <defaults>
</compile_context>

<pallas_src>
import math
import functools

import numpy as np
import jax
import jax.numpy as jnp
from jax import lax
from jax.experimental import pallas as pl
from jax.experimental.pallas import tpu as pltpu


# Set to jnp.bfloat16 on v6e/v7x for 2x MXU throughput (accumulation stays f32).
MXU_INPUT_DTYPE = jnp.float32


# ----------------------------------------------------------------------------
# Fused Pallas kernel: whole WindowAttention forward for a block of windows.
# ----------------------------------------------------------------------------
def fused_window_attention_kernel(x_ref, pos_ref, bias_ref,
                                  wqs_ref, wqm_ref, wp_ref, bp_ref,
                                  o_ref, *, num_heads, scale, mxu_dtype):
    Bw, N, C = x_ref.shape
    hd = C // num_heads
    Nh = N // 2

    def mm(a, b):  # f32-accumulating matmul, optionally bf16 MXU inputs
        return jnp.dot(a.astype(mxu_dtype), b.astype(mxu_dtype),
                       preferred_element_type=jnp.float32)

    def mm_kt(a, b):  # a @ b.T folded into the matmul (no explicit XLU transpose)
        return lax.dot_general(a.astype(mxu_dtype), b.astype(mxu_dtype),
                               (((1,), (1,)), ((), ())),
                               preferred_element_type=jnp.float32)

    def attend(q, k, v, b=None):
        s = mm_kt(q * scale, k)                            # (M, M') scores
        if b is not None:
            s = s + b
        m = jnp.max(s, axis=-1, keepdims=True)
        p = jnp.exp(s - m)
        l = jnp.sum(p, axis=-1, keepdims=True)
        o = mm(p, v)                                       # (M, hd)
        # normalize the small (M, hd) output, reciprocal on the EUP slot
        return o * pl.reciprocal(l, approx=True)

    x = x_ref[...].astype(jnp.float32)                     # (Bw, N, C)
    pos = pos_ref[0].astype(jnp.float32)                   # (N, C)
    bias = bias_ref[...].astype(jnp.float32)               # (nH, N, N)
    wp = wp_ref[...].astype(jnp.float32)                   # (2C, C)
    bp = bp_ref[...].astype(jnp.float32)                   # (1, C)

    # QKV projections for the whole window block at once (weights VMEM-resident).
    x2d = x.reshape(Bw * N, C)
    qkv_s = mm(x2d, wqs_ref[...]).reshape(Bw, N, 3 * C)
    qkv_m = mm((x + pos[None, :, :]).reshape(Bw * N, C),
               wqm_ref[...]).reshape(Bw, N, 3 * C)

    wp_mut, wp_self = wp[:C], wp[C:]

    for w in range(Bw):                                    # static unroll over windows
        q_s = qkv_s[w, :, 0:C]
        k_s = qkv_s[w, :, C:2 * C]
        v_s = qkv_s[w, :, 2 * C:3 * C]
        q_m = qkv_m[w, :, 0:C]
        k_m = qkv_m[w, :, C:2 * C]
        v_m = qkv_m[w, :, 2 * C:3 * C]

        self_heads, mut_heads = [], []
        for h in range(num_heads):                         # static unroll over heads
            sl = slice(h * hd, (h + 1) * hd)
            # self attention (with relative position bias)
            self_heads.append(attend(q_s[:, sl], k_s[:, sl], v_s[:, sl], bias[h]))
            # mutual attention between the two frames (no bias, no zero-bias DMA)
            o1 = attend(q_m[Nh:, sl], k_m[:Nh, sl], v_m[:Nh, sl])   # frame2 -> frame1
            o2 = attend(q_m[:Nh, sl], k_m[Nh:, sl], v_m[Nh:, sl])   # frame1 -> frame2
            mut_heads.append(jnp.concatenate([o1, o2], axis=0))     # (N, hd)

        x_self = jnp.concatenate(self_heads, axis=-1)               # (N, C)
        x_mut = jnp.concatenate(mut_heads, axis=-1)                 # (N, C)

        # proj of cat([x_mut, x_self], -1) without materializing the (N, 2C) concat
        y = mm(x_mut, wp_mut) + mm(x_self, wp_self) + bp
        o_ref[w] = y.astype(o_ref.dtype)


# ----------------------------------------------------------------------------
# Wrapper: one-time precompute + fused pallas_call
# ----------------------------------------------------------------------------
def prepare_window_attention(params, buffers, N, num_heads):
    """Init-time precompute of kernel-ready operands (hoisted off the hot path)."""
    rel_idx = buffers["relative_position_index"][:N, :N].reshape(-1)
    rel_bias = params["relative_position_bias_table"][rel_idx]          # (N*N, nH)
    rel_bias = rel_bias.reshape(N, N, num_heads).transpose(2, 0, 1)     # (nH, N, N)
    pos_tiled = jnp.tile(buffers["position_bias"], (1, 2, 1))           # (1, N, C)
    return {
        "rel_bias": rel_bias.astype(jnp.float32),
        "pos": pos_tiled.astype(jnp.float32),
        "w_qkv_self": params["w_qkv_self"].astype(jnp.float32),
        "w_qkv_mut": params["w_qkv_mut"].astype(jnp.float32),
        "w_proj": params["w_proj"].astype(jnp.float32),
        "b_proj": params["b_proj"].reshape(1, -1).astype(jnp.float32),
    }


def window_attention_forward_pallas(x, prepared, num_heads, scale,
                                    windows_per_block=1):
    """x: (B_, N, C) -> (B_, N, C). Entire WindowAttention forward in one kernel."""
    B_, N, C = x.shape
    Bw = windows_per_block
    assert B_ % Bw == 0, "windows_per_block must divide B_"
    kern = functools.partial(fused_window_attention_kernel,
                             num_heads=num_heads, scale=scale,
                             mxu_dtype=MXU_INPUT_DTYPE)
    return pl.pallas_call(
        kern,
        out_shape=jax.ShapeDtypeStruct((B_, N, C), x.dtype),
        grid=(B_ // Bw,),
        in_specs=[
            pl.BlockSpec((Bw, N, C), lambda b: (b, 0, 0)),           # x (streamed)
            pl.BlockSpec((1, N, C), lambda b: (0, 0, 0)),            # sine pos (resident)
            pl.BlockSpec((num_heads, N, N), lambda b: (0, 0, 0)),    # rel bias (resident)
            pl.BlockSpec((C, 3 * C), lambda b: (0, 0)),              # w_qkv_self (resident)
            pl.BlockSpec((C, 3 * C), lambda b: (0, 0)),              # w_qkv_mut (resident)
            pl.BlockSpec((2 * C, C), lambda b: (0, 0)),              # w_proj (resident)
            pl.BlockSpec((1, C), lambda b: (0, 0)),                  # b_proj (resident)
        ],
        out_specs=pl.BlockSpec((Bw, N, C), lambda b: (b, 0, 0)),
        compiler_params=pltpu.CompilerParams(
            dimension_semantics=("parallel",)),                      # v7x: split over TCs
    )(x, prepared["pos"], prepared["rel_bias"],
      prepared["w_qkv_self"], prepared["w_qkv_mut"],
      prepared["w_proj"], prepared["b_proj"])


# ----------------------------------------------------------------------------
# Pure-JAX reference (mirrors the PyTorch module) for verification
# ----------------------------------------------------------------------------
def window_attention_reference(x, params, buffers, num_heads, scale):
    HI = jax.lax.Precision.HIGHEST
    B_, N, C = x.shape
    hd = C // num_heads

    def attention(q, k, v, bias=None):
        attn = jnp.einsum("bhnd,bhmd->bhnm", q * scale, k, precision=HI)
        if bias is not None:
            attn = attn + bias[None]
        attn = jax.nn.softmax(attn, axis=-1)
        out = jnp.einsum("bhnm,bhmd->bhnd", attn, v, precision=HI)
        Bq, nH, Nq, hdq = q.shape
        return out.transpose(0, 2, 1, 3).reshape(Bq, Nq, nH * hdq)

    qkv = (x.reshape(B_ * N, C) @ params["w_qkv_self"]).reshape(
        B_, N, 3, num_heads, hd).transpose(2, 0, 3, 1, 4)
    q, k, v = qkv[0], qkv[1], qkv[2]
    rel_idx = buffers["relative_position_index"][:N, :N].reshape(-1)
    rel_bias = params["relative_position_bias_table"][rel_idx]
    rel_bias = rel_bias.reshape(N, N, num_heads).transpose(2, 0, 1)
    x_self = attention(q, k, v, rel_bias)

    pos = jnp.tile(buffers["position_bias"], (1, 2, 1))
    qkv_m = ((x + pos).reshape(B_ * N, C) @ params["w_qkv_mut"]).reshape(
        B_, N, 3, num_heads, hd).transpose(2, 0, 3, 1, 4)
    qm, km, vm = qkv_m[0], qkv_m[1], qkv_m[2]
    Nh = N // 2
    x1 = attention(qm[:, :, Nh:], km[:, :, :Nh], vm[:, :, :Nh])
    x2 = attention(qm[:, :, :Nh], km[:, :, Nh:], vm[:, :, Nh:])
    x_out = jnp.concatenate([jnp.concatenate([x1, x2], axis=1), x_self], axis=2)
    y = x_out.reshape(B_ * N, 2 * C) @ params["w_proj"] + params["b_proj"][None]
    return y.reshape(B_, N, C)


# ----------------------------------------------------------------------------
# Module-level precomputed buffers (numpy, deterministic)
# ----------------------------------------------------------------------------
def get_position_index(window_size):
    d, h, w = window_size
    coords = np.stack(np.meshgrid(np.arange(d), np.arange(h), np.arange(w),
                                  indexing="ij"))                    # (3, d, h, w)
    coords_flatten = coords.reshape(3, -1)                           # (3, N)
    rel = coords_flatten[:, :, None] - coords_flatten[:, None, :]    # (3, N, N)
    rel = rel.transpose(1, 2, 0).astype(np.int64)                    # (N, N, 3)
    rel[:, :, 0] += d - 1
    rel[:, :, 1] += h - 1
    rel[:, :, 2] += w - 1
    rel[:, :, 0] *= (2 * h - 1) * (2 * w - 1)
    rel[:, :, 1] *= 2 * w - 1
    return rel.sum(-1)                                               # (N, N)


def get_sine_position_encoding(HW, num_pos_feats, temperature=10000, normalize=True):
    scale = 2 * math.pi
    H, W = HW
    not_mask = np.ones((1, H, W), np.float32)
    y_embed = not_mask.cumsum(1)
    x_embed = not_mask.cumsum(2)
    if normalize:
        eps = 1e-6
        y_embed = y_embed / (y_embed[:, -1:, :] + eps) * scale
        x_embed = x_embed / (x_embed[:, :, -1:] + eps) * scale
    dim_t = np.arange(num_pos_feats, dtype=np.float32)
    dim_t = temperature ** (2 * (dim_t // 2) / num_pos_feats)
    pos_x = x_embed[:, :, :, None] / dim_t
    pos_y = y_embed[:, :, :, None] / dim_t
    pos_x = np.stack((np.sin(pos_x[:, :, :, 0::2]),
                      np.cos(pos_x[:, :, :, 1::2])), axis=4).reshape(1, H, W, -1)
    pos_y = np.stack((np.sin(pos_y[:, :, :, 0::2]),
                      np.cos(pos_y[:, :, :, 1::2])), axis=4).reshape(1, H, W, -1)
    pos_embed = np.concatenate((pos_y, pos_x), axis=3)               # (1, H, W, C)
    return pos_embed.reshape(1, H * W, -1).astype(np.float32)        # (1, H*W, C)


# ----------------------------------------------------------------------------
# main
# ----------------------------------------------------------------------------
if __name__ == "__main__":
    # Small, module-consistent config: window (2, 4, 4) -> N = 32 tokens
    dim = 32
    num_heads = 4
    window_size = (2, 4, 4)
    N = window_size[0] * window_size[1] * window_size[2]             # 32
    B_ = 2
    head_dim = dim // num_heads
    scale = head_dim ** (-0.5)

    key = jax.random.PRNGKey(0)
    k_x, k_tbl, k_qs, k_qm, k_wp, k_bp = jax.random.split(key, 6)

    num_rel = ((2 * window_size[0] - 1) * (2 * window_size[1] - 1)
               * (2 * window_size[2] - 1))
    params = {
        # trunc_normal_(std=0.02) approximated deterministically
        "relative_position_bias_table": jnp.clip(
            0.02 * jax.random.normal(k_tbl, (num_rel, num_heads), jnp.float32),
            -0.04, 0.04),
        # weights stored as (in, out) so y = x @ W (+ b)
        "w_qkv_self": 0.05 * jax.random.normal(k_qs, (dim, 3 * dim), jnp.float32),
        "w_qkv_mut":  0.05 * jax.random.normal(k_qm, (dim, 3 * dim), jnp.float32),
        "w_proj":     0.05 * jax.random.normal(k_wp, (2 * dim, dim), jnp.float32),
        "b_proj":     0.05 * jax.random.normal(k_bp, (dim,), jnp.float32),
    }
    buffers = {
        "relative_position_index": jnp.asarray(get_position_index(window_size)),
        "position_bias": jnp.asarray(
            get_sine_position_encoding(window_size[1:], dim // 2, normalize=True)),
    }

    x = jax.random.normal(k_x, (B_, N, dim), jnp.float32)

    # One-time init-time precompute (bias gather / pos tiling hoisted off hot path).
    prepared = prepare_window_attention(params, buffers, N, num_heads)

    # Fused Pallas forward (single pallas_call).
    fwd = jax.jit(lambda xx: window_attention_forward_pallas(
        xx, prepared, num_heads, scale, windows_per_block=1))
    out = jax.block_until_ready(fwd(x))

    # Pure-JAX reference for sanity.
    ref = jax.block_until_ready(
        window_attention_reference(x, params, buffers, num_heads, scale))

    np.testing.assert_allclose(np.asarray(out), np.asarray(ref), rtol=1e-2, atol=1e-2)
    assert out.shape == (B_, N, dim)
    print("KERNEL_OK")
</pallas_src>

<mosaic_0001>
module attributes {stable_mosaic.version = 11 : i64} {
  func.func @fused_window_attention_kernel(%arg0: i32, %arg1: memref<1x32x32xf32, #tpu.memory_space<vmem>>, %arg2: memref<1x32x32xf32, #tpu.memory_space<vmem>>, %arg3: memref<4x32x32xf32, #tpu.memory_space<vmem>>, %arg4: memref<32x96xf32, #tpu.memory_space<vmem>>, %arg5: memref<32x96xf32, #tpu.memory_space<vmem>>, %arg6: memref<64x32xf32, #tpu.memory_space<vmem>>, %arg7: memref<1x32xf32, #tpu.memory_space<vmem>>, %arg8: memref<1x32x32xf32, #tpu.memory_space<vmem>>) attributes {dimension_semantics = [#tpu.dimension_semantics<parallel>], iteration_bounds = array<i64: 2>, scalar_prefetch = 0 : i64, scratch_operands = 0 : i64, tpu.core_type = #tpu.core_type<tc>, window_params = [{transform_indices = @transform_0, window_bounds = array<i64: 1, 32, 32>}, {pipeline_mode = #tpu.pipeline_mode<synchronous>, transform_indices = @transform_1, window_bounds = array<i64: 1, 32, 32>}, {pipeline_mode = #tpu.pipeline_mode<synchronous>, transform_indices = @transform_2, window_bounds = array<i64: 4, 32, 32>}, {pipeline_mode = #tpu.pipeline_mode<synchronous>, transform_indices = @transform_3, window_bounds = array<i64: 32, 96>}, {pipeline_mode = #tpu.pipeline_mode<synchronous>, transform_indices = @transform_4, window_bounds = array<i64: 32, 96>}, {pipeline_mode = #tpu.pipeline_mode<synchronous>, transform_indices = @transform_5, window_bounds = array<i64: 64, 32>}, {pipeline_mode = #tpu.pipeline_mode<synchronous>, transform_indices = @transform_6, window_bounds = array<i64: 1, 32>}, {transform_indices = @transform_7, window_bounds = array<i64: 1, 32, 32>}]} {
    %c0 = arith.constant 0 : index
    %c0_0 = arith.constant 0 : index
    %c0_1 = arith.constant 0 : index
    %0 = vector.load %arg1[%c0, %c0_0, %c0_1] : memref<1x32x32xf32, #tpu.memory_space<vmem>>, vector<1x32x32xf32>
    %c0_2 = arith.constant 0 : index
    %c0_3 = arith.constant 0 : index
    %c0_4 = arith.constant 0 : index
    %1 = vector.load %arg2[%c0_2, %c0_3, %c0_4] : memref<1x32x32xf32, #tpu.memory_space<vmem>>, vector<1x32x32xf32>
    %2 = vector.shape_cast %1 : vector<1x32x32xf32> to vector<32x32xf32>
    %c0_5 = arith.constant 0 : index
    %c0_6 = arith.constant 0 : index
    %c0_7 = arith.constant 0 : index
    %3 = vector.load %arg3[%c0_5, %c0_6, %c0_7] : memref<4x32x32xf32, #tpu.memory_space<vmem>>, vector<4x32x32xf32>
    %c0_8 = arith.constant 0 : index
    %c0_9 = arith.constant 0 : index
    %4 = vector.load %arg6[%c0_8, %c0_9] : memref<64x32xf32, #tpu.memory_space<vmem>>, vector<64x32xf32>
    %c0_10 = arith.constant 0 : index
    %c0_11 = arith.constant 0 : index
    %5 = vector.load %arg7[%c0_10, %c0_11] : memref<1x32xf32, #tpu.memory_space<vmem>>, vector<1x32xf32>
    %6 = vector.shape_cast %0 : vector<1x32x32xf32> to vector<32x32xf32>
    %c0_12 = arith.constant 0 : index
    %c0_13 = arith.constant 0 : index
    %7 = vector.load %arg4[%c0_12, %c0_13] : memref<32x96xf32, #tpu.memory_space<vmem>>, vector<32x96xf32>
    %cst = arith.constant dense<0.000000e+00> : vector<32x96xf32>
    %8 = tpu.matmul %6, %7, %cst {dimension_numbers = #tpu.dot_dimension_numbers<[1], [0], [0], [1], [0, 0, 1, 1], [], []>} : vector<32x32xf32>, vector<32x96xf32>, vector<32x96xf32> -> vector<32x96xf32>
    %9 = vector.shape_cast %8 : vector<32x96xf32> to vector<1x32x96xf32>
    %10 = vector.shape_cast %2 : vector<32x32xf32> to vector<1x32x32xf32>
    %11 = arith.addf %0, %10 : vector<1x32x32xf32>
    %12 = vector.shape_cast %11 : vector<1x32x32xf32> to vector<32x32xf32>
    %c0_14 = arith.constant 0 : index
    %c0_15 = arith.constant 0 : index
    %13 = vector.load %arg5[%c0_14, %c0_15] : memref<32x96xf32, #tpu.memory_space<vmem>>, vector<32x96xf32>
    %cst_16 = arith.constant dense<0.000000e+00> : vector<32x96xf32>
    %14 = tpu.matmul %12, %13, %cst_16 {dimension_numbers = #tpu.dot_dimension_numbers<[1], [0], [0], [1], [0, 0, 1, 1], [], []>} : vector<32x32xf32>, vector<32x96xf32>, vector<32x96xf32> -> vector<32x96xf32>
    %15 = vector.shape_cast %14 : vector<32x96xf32> to vector<1x32x96xf32>
    %16 = vector.extract_strided_slice %4 {offsets = [0, 0], sizes = [32, 32], strides = [1, 1]} : vector<64x32xf32> to vector<32x32xf32>
    %17 = vector.extract_strided_slice %4 {offsets = [32, 0], sizes = [32, 32], strides = [1, 1]} : vector<64x32xf32> to vector<32x32xf32>
    %18 = vector.extract_strided_slice %9 {offsets = [0, 0, 0], sizes = [1, 32, 32], strides = [1, 1, 1]} : vector<1x32x96xf32> to vector<1x32x32xf32>
    %19 = vector.shape_cast %18 : vector<1x32x32xf32> to vector<32x32xf32>
    %20 = vector.extract_strided_slice %9 {offsets = [0, 0, 32], sizes = [1, 32, 32], strides = [1, 1, 1]} : vector<1x32x96xf32> to vector<1x32x32xf32>
    %21 = vector.shape_cast %20 : vector<1x32x32xf32> to vector<32x32xf32>
    %22 = vector.extract_strided_slice %9 {offsets = [0, 0, 64], sizes = [1, 32, 32], strides = [1, 1, 1]} : vector<1x32x96xf32> to vector<1x32x32xf32>
    %23 = vector.shape_cast %22 : vector<1x32x32xf32> to vector<32x32xf32>
    %24 = vector.extract_strided_slice %15 {offsets = [0, 0, 0], sizes = [1, 32, 32], strides = [1, 1, 1]} : vector<1x32x96xf32> to vector<1x32x32xf32>
    %25 = vector.shape_cast %24 : vector<1x32x32xf32> to vector<32x32xf32>
    %26 = vector.extract_strided_slice %15 {offsets = [0, 0, 32], sizes = [1, 32, 32], strides = [1, 1, 1]} : vector<1x32x96xf32> to vector<1x32x32xf32>
    %27 = vector.shape_cast %26 : vector<1x32x32xf32> to vector<32x32xf32>
    %28 = vector.extract_strided_slice %15 {offsets = [0, 0, 64], sizes = [1, 32, 32], strides = [1, 1, 1]} : vector<1x32x96xf32> to vector<1x32x32xf32>
    %29 = vector.shape_cast %28 : vector<1x32x32xf32> to vector<32x32xf32>
    %30 = vector.extract_strided_slice %19 {offsets = [0, 0], sizes = [32, 8], strides = [1, 1]} : vector<32x32xf32> to vector<32x8xf32>
    %31 = vector.extract_strided_slice %21 {offsets = [0, 0], sizes = [32, 8], strides = [1, 1]} : vector<32x32xf32> to vector<32x8xf32>
    %32 = vector.extract_strided_slice %23 {offsets = [0, 0], sizes = [32, 8], strides = [1, 1]} : vector<32x32xf32> to vector<32x8xf32>
    %33 = vector.extract_strided_slice %3 {offsets = [0, 0, 0], sizes = [1, 32, 32], strides = [1, 1, 1]} : vector<4x32x32xf32> to vector<1x32x32xf32>
    %34 = vector.shape_cast %33 : vector<1x32x32xf32> to vector<32x32xf32>
    %cst_17 = arith.constant 0.353553385 : f32
    %35 = vector.broadcast %cst_17 : f32 to vector<32x8xf32>
    %36 = arith.mulf %30, %35 : vector<32x8xf32>
    %cst_18 = arith.constant dense<0.000000e+00> : vector<32x32xf32>
    %37 = tpu.matmul %36, %31, %cst_18 {dimension_numbers = #tpu.dot_dimension_numbers<[1], [1], [0], [0], [0, 0, 1, 0], [], []>} : vector<32x8xf32>, vector<32x8xf32>, vector<32x32xf32> -> vector<32x32xf32>
    %38 = arith.addf %37, %34 : vector<32x32xf32>
    %cst_19 = arith.constant dense<0xFF800000> : vector<32xf32>
    %39 = vector.multi_reduction <maximumf>, %38, %cst_19 [1] : vector<32x32xf32> to vector<32xf32>
    %40 = vector.shape_cast %39 : vector<32xf32> to vector<32x1xf32>
    %41 = vector.broadcast %40 : vector<32x1xf32> to vector<32x32xf32>
    %42 = arith.subf %38, %41 : vector<32x32xf32>
    %43 = math.exp %42 : vector<32x32xf32>
    %cst_20 = arith.constant dense<0.000000e+00> : vector<32xf32>
    %44 = vector.multi_reduction <add>, %43, %cst_20 [1] : vector<32x32xf32> to vector<32xf32>
    %45 = vector.shape_cast %44 : vector<32xf32> to vector<32x1xf32>
    %cst_21 = arith.constant dense<0.000000e+00> : vector<32x8xf32>
    %46 = tpu.matmul %43, %32, %cst_21 {dimension_numbers = #tpu.dot_dimension_numbers<[1], [0], [0], [1], [0, 0, 1, 1], [], []>} : vector<32x32xf32>, vector<32x8xf32>, vector<32x8xf32> -> vector<32x8xf32>
    %47 = tpu.reciprocal %45 {approx = true} : vector<32x1xf32> -> vector<32x1xf32>
    %48 = vector.broadcast %47 : vector<32x1xf32> to vector<32x8xf32>
    %49 = arith.mulf %46, %48 : vector<32x8xf32>
    %50 = vector.extract_strided_slice %25 {offsets = [16, 0], sizes = [16, 8], strides = [1, 1]} : vector<32x32xf32> to vector<16x8xf32>
    %51 = vector.extract_strided_slice %27 {offsets = [0, 0], sizes = [16, 8], strides = [1, 1]} : vector<32x32xf32> to vector<16x8xf32>
    %52 = vector.extract_strided_slice %29 {offsets = [0, 0], sizes = [16, 8], strides = [1, 1]} : vector<32x32xf32> to vector<16x8xf32>
    %cst_22 = arith.constant 0.353553385 : f32
    %53 = vector.broadcast %cst_22 : f32 to vector<16x8xf32>
    %54 = arith.mulf %50, %53 : vector<16x8xf32>
    %cst_23 = arith.constant dense<0.000000e+00> : vector<16x16xf32>
    %55 = tpu.matmul %54, %51, %cst_23 {dimension_numbers = #tpu.dot_dimension_numbers<[1], [1], [0], [0], [0, 0, 1, 0], [], []>} : vector<16x8xf32>, vector<16x8xf32>, vector<16x16xf32> -> vector<16x16xf32>
    %cst_24 = arith.constant dense<0xFF800000> : vector<16xf32>
    %56 = vector.multi_reduction <maximumf>, %55, %cst_24 [1] : vector<16x16xf32> to vector<16xf32>
    %57 = vector.shape_cast %56 : vector<16xf32> to vector<16x1xf32>
    %58 = vector.broadcast %57 : vector<16x1xf32> to vector<16x16xf32>
    %59 = arith.subf %55, %58 : vector<16x16xf32>
    %60 = math.exp %59 : vector<16x16xf32>
    %cst_25 = arith.constant dense<0.000000e+00> : vector<16xf32>
    %61 = vector.multi_reduction <add>, %60, %cst_25 [1] : vector<16x16xf32> to vector<16xf32>
    %62 = vector.shape_cast %61 : vector<16xf32> to vector<16x1xf32>
    %cst_26 = arith.constant dense<0.000000e+00> : vector<16x8xf32>
    %63 = tpu.matmul %60, %52, %cst_26 {dimension_numbers = #tpu.dot_dimension_numbers<[1], [0], [0], [1], [0, 0, 1, 1], [], []>} : vector<16x16xf32>, vector<16x8xf32>, vector<16x8xf32> -> vector<16x8xf32>
    %64 = tpu.reciprocal %62 {approx = true} : vector<16x1xf32> -> vector<16x1xf32>
    %65 = vector.broadcast %64 : vector<16x1xf32> to vector<16x8xf32>
    %66 = arith.mulf %63, %65 : vector<16x8xf32>
    %67 = vector.extract_strided_slice %25 {offsets = [0, 0], sizes = [16, 8], strides = [1, 1]} : vector<32x32xf32> to vector<16x8xf32>
    %68 = vector.extract_strided_slice %27 {offsets = [16, 0], sizes = [16, 8], strides = [1, 1]} : vector<32x32xf32> to vector<16x8xf32>
    %69 = vector.extract_strided_slice %29 {offsets = [16, 0], sizes = [16, 8], strides = [1, 1]} : vector<32x32xf32> to vector<16x8xf32>
    %cst_27 = arith.constant 0.353553385 : f32
    %70 = vector.broadcast %cst_27 : f32 to vector<16x8xf32>
    %71 = arith.mulf %67, %70 : vector<16x8xf32>
    %cst_28 = arith.constant dense<0.000000e+00> : vector<16x16xf32>
    %72 = tpu.matmul %71, %68, %cst_28 {dimension_numbers = #tpu.dot_dimension_numbers<[1], [1], [0], [0], [0, 0, 1, 0], [], []>} : vector<16x8xf32>, vector<16x8xf32>, vector<16x16xf32> -> vector<16x16xf32>
    %cst_29 = arith.constant dense<0xFF800000> : vector<16xf32>
    %73 = vector.multi_reduction <maximumf>, %72, %cst_29 [1] : vector<16x16xf32> to vector<16xf32>
    %74 = vector.shape_cast %73 : vector<16xf32> to vector<16x1xf32>
    %75 = vector.broadcast %74 : vector<16x1xf32> to vector<16x16xf32>
    %76 = arith.subf %72, %75 : vector<16x16xf32>
    %77 = math.exp %76 : vector<16x16xf32>
    %cst_30 = arith.constant dense<0.000000e+00> : vector<16xf32>
    %78 = vector.multi_reduction <add>, %77, %cst_30 [1] : vector<16x16xf32> to vector<16xf32>
    %79 = vector.shape_cast %78 : vector<16xf32> to vector<16x1xf32>
    %cst_31 = arith.constant dense<0.000000e+00> : vector<16x8xf32>
    %80 = tpu.matmul %77, %69, %cst_31 {dimension_numbers = #tpu.dot_dimension_numbers<[1], [0], [0], [1], [0, 0, 1, 1], [], []>} : vector<16x16xf32>, vector<16x8xf32>, vector<16x8xf32> -> vector<16x8xf32>
    %81 = tpu.reciprocal %79 {approx = true} : vector<16x1xf32> -> vector<16x1xf32>
    %82 = vector.broadcast %81 : vector<16x1xf32> to vector<16x8xf32>
    %83 = arith.mulf %80, %82 : vector<16x8xf32>
    %84 = tpu.concatenate %66, %83 in 0 : vector<16x8xf32>, vector<16x8xf32> -> vector<32x8xf32>
    %85 = vector.extract_strided_slice %19 {offsets = [0, 8], sizes = [32, 8], strides = [1, 1]} : vector<32x32xf32> to vector<32x8xf32>
    %86 = vector.extract_strided_slice %21 {offsets = [0, 8], sizes = [32, 8], strides = [1, 1]} : vector<32x32xf32> to vector<32x8xf32>
    %87 = vector.extract_strided_slice %23 {offsets = [0, 8], sizes = [32, 8], strides = [1, 1]} : vector<32x32xf32> to vector<32x8xf32>
    %88 = vector.extract_strided_slice %3 {offsets = [1, 0, 0], sizes = [1, 32, 32], strides = [1, 1, 1]} : vector<4x32x32xf32> to vector<1x32x32xf32>
    %89 = vector.shape_cast %88 : vector<1x32x32xf32> to vector<32x32xf32>
    %cst_32 = arith.constant 0.353553385 : f32
    %90 = vector.broadcast %cst_32 : f32 to vector<32x8xf32>
    %91 = arith.mulf %85, %90 : vector<32x8xf32>
    %cst_33 = arith.constant dense<0.000000e+00> : vector<32x32xf32>
    %92 = tpu.matmul %91, %86, %cst_33 {dimension_numbers = #tpu.dot_dimension_numbers<[1], [1], [0], [0], [0, 0, 1, 0], [], []>} : vector<32x8xf32>, vector<32x8xf32>, vector<32x32xf32> -> vector<32x32xf32>
    %93 = arith.addf %92, %89 : vector<32x32xf32>
    %cst_34 = arith.constant dense<0xFF800000> : vector<32xf32>
    %94 = vector.multi_reduction <maximumf>, %93, %cst_34 [1] : vector<32x32xf32> to vector<32xf32>
    %95 = vector.shape_cast %94 : vector<32xf32> to vector<32x1xf32>
    %96 = vector.broadcast %95 : vector<32x1xf32> to vector<32x32xf32>
    %97 = arith.subf %93, %96 : vector<32x32xf32>
    %98 = math.exp %97 : vector<32x32xf32>
    %cst_35 = arith.constant dense<0.000000e+00> : vector<32xf32>
    %99 = vector.multi_reduction <add>, %98, %cst_35 [1] : vector<32x32xf32> to vector<32xf32>
    %100 = vector.shape_cast %99 : vector<32xf32> to vector<32x1xf32>
    %cst_36 = arith.constant dense<0.000000e+00> : vector<32x8xf32>
    %101 = tpu.matmul %98, %87, %cst_36 {dimension_numbers = #tpu.dot_dimension_numbers<[1], [0], [0], [1], [0, 0, 1, 1], [], []>} : vector<32x32xf32>, vector<32x8xf32>, vector<32x8xf32> -> vector<32x8xf32>
    %102 = tpu.reciprocal %100 {approx = true} : vector<32x1xf32> -> vector<32x1xf32>
    %103 = vector.broadcast %102 : vector<32x1xf32> to vector<32x8xf32>
    %104 = arith.mulf %101, %103 : vector<32x8xf32>
    %105 = vector.extract_strided_slice %25 {offsets = [16, 8], sizes = [16, 8], strides = [1, 1]} : vector<32x32xf32> to vector<16x8xf32>
    %106 = vector.extract_strided_slice %27 {offsets = [0, 8], sizes = [16, 8], strides = [1, 1]} : vector<32x32xf32> to vector<16x8xf32>
    %107 = vector.extract_strided_slice %29 {offsets = [0, 8], sizes = [16, 8], strides = [1, 1]} : vector<32x32xf32> to vector<16x8xf32>
    %cst_37 = arith.constant 0.353553385 : f32
    %108 = vector.broadcast %cst_37 : f32 to vector<16x8xf32>
    %109 = arith.mulf %105, %108 : vector<16x8xf32>
    %cst_38 = arith.constant dense<0.000000e+00> : vector<16x16xf32>
    %110 = tpu.matmul %109, %106, %cst_38 {dimension_numbers = #tpu.dot_dimension_numbers<[1], [1], [0], [0], [0, 0, 1, 0], [], []>} : vector<16x8xf32>, vector<16x8xf32>, vector<16x16xf32> -> vector<16x16xf32>
    %cst_39 = arith.constant dense<0xFF800000> : vector<16xf32>
    %111 = vector.multi_reduction <maximumf>, %110, %cst_39 [1] : vector<16x16xf32> to vector<16xf32>
    %112 = vector.shape_cast %111 : vector<16xf32> to vector<16x1xf32>
    %113 = vector.broadcast %112 : vector<16x1xf32> to vector<16x16xf32>
    %114 = arith.subf %110, %113 : vector<16x16xf32>
    %115 = math.exp %114 : vector<16x16xf32>
    %cst_40 = arith.constant dense<0.000000e+00> : vector<16xf32>
    %116 = vector.multi_reduction <add>, %115, %cst_40 [1] : vector<16x16xf32> to vector<16xf32>
    %117 = vector.shape_cast %116 : vector<16xf32> to vector<16x1xf32>
    %cst_41 = arith.constant dense<0.000000e+00> : vector<16x8xf32>
    %118 = tpu.matmul %115, %107, %cst_41 {dimension_numbers = #tpu.dot_dimension_numbers<[1], [0], [0], [1], [0, 0, 1, 1], [], []>} : vector<16x16xf32>, vector<16x8xf32>, vector<16x8xf32> -> vector<16x8xf32>
    %119 = tpu.reciprocal %117 {approx = true} : vector<16x1xf32> -> vector<16x1xf32>
    %120 = vector.broadcast %119 : vector<16x1xf32> to vector<16x8xf32>
    %121 = arith.mulf %118, %120 : vector<16x8xf32>
    %122 = vector.extract_strided_slice %25 {offsets = [0, 8], sizes = [16, 8], strides = [1, 1]} : vector<32x32xf32> to vector<16x8xf32>
    %123 = vector.extract_strided_slice %27 {offsets = [16, 8], sizes = [16, 8], strides = [1, 1]} : vector<32x32xf32> to vector<16x8xf32>
    %124 = vector.extract_strided_slice %29 {offsets = [16, 8], sizes = [16, 8], strides = [1, 1]} : vector<32x32xf32> to vector<16x8xf32>
    %cst_42 = arith.constant 0.353553385 : f32
    %125 = vector.broadcast %cst_42 : f32 to vector<16x8xf32>
    %126 = arith.mulf %122, %125 : vector<16x8xf32>
    %cst_43 = arith.constant dense<0.000000e+00> : vector<16x16xf32>
    %127 = tpu.matmul %126, %123, %cst_43 {dimension_numbers = #tpu.dot_dimension_numbers<[1], [1], [0], [0], [0, 0, 1, 0], [], []>} : vector<16x8xf32>, vector<16x8xf32>, vector<16x16xf32> -> vector<16x16xf32>
    %cst_44 = arith.constant dense<0xFF800000> : vector<16xf32>
    %128 = vector.multi_reduction <maximumf>, %127, %cst_44 [1] : vector<16x16xf32> to vector<16xf32>
    %129 = vector.shape_cast %128 : vector<16xf32> to vector<16x1xf32>
    %130 = vector.broadcast %129 : vector<16x1xf32> to vector<16x16xf32>
    %131 = arith.subf %127, %130 : vector<16x16xf32>
    %132 = math.exp %131 : vector<16x16xf32>
    %cst_45 = arith.constant dense<0.000000e+00> : vector<16xf32>
    %133 = vector.multi_reduction <add>, %132, %cst_45 [1] : vector<16x16xf32> to vector<16xf32>
    %134 = vector.shape_cast %133 : vector<16xf32> to vector<16x1xf32>
    %cst_46 = arith.constant dense<0.000000e+00> : vector<16x8xf32>
    %135 = tpu.matmul %132, %124, %cst_46 {dimension_numbers = #tpu.dot_dimension_numbers<[1], [0], [0], [1], [0, 0, 1, 1], [], []>} : vector<16x16xf32>, vector<16x8xf32>, vector<16x8xf32> -> vector<16x8xf32>
    %136 = tpu.reciprocal %134 {approx = true} : vector<16x1xf32> -> vector<16x1xf32>
    %137 = vector.broadcast %136 : vector<16x1xf32> to vector<16x8xf32>
    %138 = arith.mulf %135, %137 : vector<16x8xf32>
    %139 = tpu.concatenate %121, %138 in 0 : vector<16x8xf32>, vector<16x8xf32> -> vector<32x8xf32>
    %140 = vector.extract_strided_slice %19 {offsets = [0, 16], sizes = [32, 8], strides = [1, 1]} : vector<32x32xf32> to vector<32x8xf32>
    %141 = vector.extract_strided_slice %21 {offsets = [0, 16], sizes = [32, 8], strides = [1, 1]} : vector<32x32xf32> to vector<32x8xf32>
    %142 = vector.extract_strided_slice %23 {offsets = [0, 16], sizes = [32, 8], strides = [1, 1]} : vector<32x32xf32> to vector<32x8xf32>
    %143 = vector.extract_strided_slice %3 {offsets = [2, 0, 0], sizes = [1, 32, 32], strides = [1, 1, 1]} : vector<4x32x32xf32> to vector<1x32x32xf32>
    %144 = vector.shape_cast %143 : vector<1x32x32xf32> to vector<32x32xf32>
    %cst_47 = arith.constant 0.353553385 : f32
    %145 = vector.broadcast %cst_47 : f32 to vector<32x8xf32>
    %146 = arith.mulf %140, %145 : vector<32x8xf32>
    %cst_48 = arith.constant dense<0.000000e+00> : vector<32x32xf32>
    %147 = tpu.matmul %146, %141, %cst_48 {dimension_numbers = #tpu.dot_dimension_numbers<[1], [1], [0], [0], [0, 0, 1, 0], [], []>} : vector<32x8xf32>, vector<32x8xf32>, vector<32x32xf32> -> vector<32x32xf32>
    %148 = arith.addf %147, %144 : vector<32x32xf32>
    %cst_49 = arith.constant dense<0xFF800000> : vector<32xf32>
    %149 = vector.multi_reduction <maximumf>, %148, %cst_49 [1] : vector<32x32xf32> to vector<32xf32>
    %150 = vector.shape_cast %149 : vector<32xf32> to vector<32x1xf32>
    %151 = vector.broadcast %150 : vector<32x1xf32> to vector<32x32xf32>
    %152 = arith.subf %148, %151 : vector<32x32xf32>
    %153 = math.exp %152 : vector<32x32xf32>
    %cst_50 = arith.constant dense<0.000000e+00> : vector<32xf32>
    %154 = vector.multi_reduction <add>, %153, %cst_50 [1] : vector<32x32xf32> to vector<32xf32>
    %155 = vector.shape_cast %154 : vector<32xf32> to vector<32x1xf32>
    %cst_51 = arith.constant dense<0.000000e+00> : vector<32x8xf32>
    %156 = tpu.matmul %153, %142, %cst_51 {dimension_numbers = #tpu.dot_dimension_numbers<[1], [0], [0], [1], [0, 0, 1, 1], [], []>} : vector<32x32xf32>, vector<32x8xf32>, vector<32x8xf32> -> vector<32x8xf32>
    %157 = tpu.reciprocal %155 {approx = true} : vector<32x1xf32> -> vector<32x1xf32>
    %158 = vector.broadcast %157 : vector<32x1xf32> to vector<32x8xf32>
    %159 = arith.mulf %156, %158 : vector<32x8xf32>
    %160 = vector.extract_strided_slice %25 {offsets = [16, 16], sizes = [16, 8], strides = [1, 1]} : vector<32x32xf32> to vector<16x8xf32>
    %161 = vector.extract_strided_slice %27 {offsets = [0, 16], sizes = [16, 8], strides = [1, 1]} : vector<32x32xf32> to vector<16x8xf32>
    %162 = vector.extract_strided_slice %29 {offsets = [0, 16], sizes = [16, 8], strides = [1, 1]} : vector<32x32xf32> to vector<16x8xf32>
    %cst_52 = arith.constant 0.353553385 : f32
    %163 = vector.broadcast %cst_52 : f32 to vector<16x8xf32>
    %164 = arith.mulf %160, %163 : vector<16x8xf32>
    %cst_53 = arith.constant dense<0.000000e+00> : vector<16x16xf32>
    %165 = tpu.matmul %164, %161, %cst_53 {dimension_numbers = #tpu.dot_dimension_numbers<[1], [1], [0], [0], [0, 0, 1, 0], [], []>} : vector<16x8xf32>, vector<16x8xf32>, vector<16x16xf32> -> vector<16x16xf32>
    %cst_54 = arith.constant dense<0xFF800000> : vector<16xf32>
    %166 = vector.multi_reduction <maximumf>, %165, %cst_54 [1] : vector<16x16xf32> to vector<16xf32>
    %167 = vector.shape_cast %166 : vector<16xf32> to vector<16x1xf32>
    %168 = vector.broadcast %167 : vector<16x1xf32> to vector<16x16xf32>
    %169 = arith.subf %165, %168 : vector<16x16xf32>
    %170 = math.exp %169 : vector<16x16xf32>
    %cst_55 = arith.constant dense<0.000000e+00> : vector<16xf32>
    %171 = vector.multi_reduction <add>, %170, %cst_55 [1] : vector<16x16xf32> to vector<16xf32>
    %172 = vector.shape_cast %171 : vector<16xf32> to vector<16x1xf32>
    %cst_56 = arith.constant dense<0.000000e+00> : vector<16x8xf32>
    %173 = tpu.matmul %170, %162, %cst_56 {dimension_numbers = #tpu.dot_dimension_numbers<[1], [0], [0], [1], [0, 0, 1, 1], [], []>} : vector<16x16xf32>, vector<16x8xf32>, vector<16x8xf32> -> vector<16x8xf32>
    %174 = tpu.reciprocal %172 {approx = true} : vector<16x1xf32> -> vector<16x1xf32>
    %175 = vector.broadcast %174 : vector<16x1xf32> to vector<16x8xf32>
    %176 = arith.mulf %173, %175 : vector<16x8xf32>
    %177 = vector.extract_strided_slice %25 {offsets = [0, 16], sizes = [16, 8], strides = [1, 1]} : vector<32x32xf32> to vector<16x8xf32>
    %178 = vector.extract_strided_slice %27 {offsets = [16, 16], sizes = [16, 8], strides = [1, 1]} : vector<32x32xf32> to vector<16x8xf32>
    %179 = vector.extract_strided_slice %29 {offsets = [16, 16], sizes = [16, 8], strides = [1, 1]} : vector<32x32xf32> to vector<16x8xf32>
    %cst_57 = arith.constant 0.353553385 : f32
    %180 = vector.broadcast %cst_57 : f32 to vector<16x8xf32>
    %181 = arith.mulf %177, %180 : vector<16x8xf32>
    %cst_58 = arith.constant dense<0.000000e+00> : vector<16x16xf32>
    %182 = tpu.matmul %181, %178, %cst_58 {dimension_numbers = #tpu.dot_dimension_numbers<[1], [1], [0], [0], [0, 0, 1, 0], [], []>} : vector<16x8xf32>, vector<16x8xf32>, vector<16x16xf32> -> vector<16x16xf32>
    %cst_59 = arith.constant dense<0xFF800000> : vector<16xf32>
    %183 = vector.multi_reduction <maximumf>, %182, %cst_59 [1] : vector<16x16xf32> to vector<16xf32>
    %184 = vector.shape_cast %183 : vector<16xf32> to vector<16x1xf32>
    %185 = vector.broadcast %184 : vector<16x1xf32> to vector<16x16xf32>
    %186 = arith.subf %182, %185 : vector<16x16xf32>
    %187 = math.exp %186 : vector<16x16xf32>
    %cst_60 = arith.constant dense<0.000000e+00> : vector<16xf32>
    %188 = vector.multi_reduction <add>, %187, %cst_60 [1] : vector<16x16xf32> to vector<16xf32>
    %189 = vector.shape_cast %188 : vector<16xf32> to vector<16x1xf32>
    %cst_61 = arith.constant dense<0.000000e+00> : vector<16x8xf32>
    %190 = tpu.matmul %187, %179, %cst_61 {dimension_numbers = #tpu.dot_dimension_numbers<[1], [0], [0], [1], [0, 0, 1, 1], [], []>} : vector<16x16xf32>, vector<16x8xf32>, vector<16x8xf32> -> vector<16x8xf32>
    %191 = tpu.reciprocal %189 {approx = true} : vector<16x1xf32> -> vector<16x1xf32>
    %192 = vector.broadcast %191 : vector<16x1xf32> to vector<16x8xf32>
    %193 = arith.mulf %190, %192 : vector<16x8xf32>
    %194 = tpu.concatenate %176, %193 in 0 : vector<16x8xf32>, vector<16x8xf32> -> vector<32x8xf32>
    %195 = vector.extract_strided_slice %19 {offsets = [0, 24], sizes = [32, 8], strides = [1, 1]} : vector<32x32xf32> to vector<32x8xf32>
    %196 = vector.extract_strided_slice %21 {offsets = [0, 24], sizes = [32, 8], strides = [1, 1]} : vector<32x32xf32> to vector<32x8xf32>
    %197 = vector.extract_strided_slice %23 {offsets = [0, 24], sizes = [32, 8], strides = [1, 1]} : vector<32x32xf32> to vector<32x8xf32>
    %198 = vector.extract_strided_slice %3 {offsets = [3, 0, 0], sizes = [1, 32, 32], strides = [1, 1, 1]} : vector<4x32x32xf32> to vector<1x32x32xf32>
    %199 = vector.shape_cast %198 : vector<1x32x32xf32> to vector<32x32xf32>
    %cst_62 = arith.constant 0.353553385 : f32
    %200 = vector.broadcast %cst_62 : f32 to vector<32x8xf32>
    %201 = arith.mulf %195, %200 : vector<32x8xf32>
    %cst_63 = arith.constant dense<0.000000e+00> : vector<32x32xf32>
    %202 = tpu.matmul %201, %196, %cst_63 {dimension_numbers = #tpu.dot_dimension_numbers<[1], [1], [0], [0], [0, 0, 1, 0], [], []>} : vector<32x8xf32>, vector<32x8xf32>, vector<32x32xf32> -> vector<32x32xf32>
    %203 = arith.addf %202, %199 : vector<32x32xf32>
    %cst_64 = arith.constant dense<0xFF800000> : vector<32xf32>
    %204 = vector.multi_reduction <maximumf>, %203, %cst_64 [1] : vector<32x32xf32> to vector<32xf32>
    %205 = vector.shape_cast %204 : vector<32xf32> to vector<32x1xf32>
    %206 = vector.broadcast %205 : vector<32x1xf32> to vector<32x32xf32>
    %207 = arith.subf %203, %206 : vector<32x32xf32>
    %208 = math.exp %207 : vector<32x32xf32>
    %cst_65 = arith.constant dense<0.000000e+00> : vector<32xf32>
    %209 = vector.multi_reduction <add>, %208, %cst_65 [1] : vector<32x32xf32> to vector<32xf32>
    %210 = vector.shape_cast %209 : vector<32xf32> to vector<32x1xf32>
    %cst_66 = arith.constant dense<0.000000e+00> : vector<32x8xf32>
    %211 = tpu.matmul %208, %197, %cst_66 {dimension_numbers = #tpu.dot_dimension_numbers<[1], [0], [0], [1], [0, 0, 1, 1], [], []>} : vector<32x32xf32>, vector<32x8xf32>, vector<32x8xf32> -> vector<32x8xf32>
    %212 = tpu.reciprocal %210 {approx = true} : vector<32x1xf32> -> vector<32x1xf32>
    %213 = vector.broadcast %212 : vector<32x1xf32> to vector<32x8xf32>
    %214 = arith.mulf %211, %213 : vector<32x8xf32>
    %215 = vector.extract_strided_slice %25 {offsets = [16, 24], sizes = [16, 8], strides = [1, 1]} : vector<32x32xf32> to vector<16x8xf32>
    %216 = vector.extract_strided_slice %27 {offsets = [0, 24], sizes = [16, 8], strides = [1, 1]} : vector<32x32xf32> to vector<16x8xf32>
    %217 = vector.extract_strided_slice %29 {offsets = [0, 24], sizes = [16, 8], strides = [1, 1]} : vector<32x32xf32> to vector<16x8xf32>
    %cst_67 = arith.constant 0.353553385 : f32
    %218 = vector.broadcast %cst_67 : f32 to vector<16x8xf32>
    %219 = arith.mulf %215, %218 : vector<16x8xf32>
    %cst_68 = arith.constant dense<0.000000e+00> : vector<16x16xf32>
    %220 = tpu.matmul %219, %216, %cst_68 {dimension_numbers = #tpu.dot_dimension_numbers<[1], [1], [0], [0], [0, 0, 1, 0], [], []>} : vector<16x8xf32>, vector<16x8xf32>, vector<16x16xf32> -> vector<16x16xf32>
    %cst_69 = arith.constant dense<0xFF800000> : vector<16xf32>
    %221 = vector.multi_reduction <maximumf>, %220, %cst_69 [1] : vector<16x16xf32> to vector<16xf32>
    %222 = vector.shape_cast %221 : vector<16xf32> to vector<16x1xf32>
    %223 = vector.broadcast %222 : vector<16x1xf32> to vector<16x16xf32>
    %224 = arith.subf %220, %223 : vector<16x16xf32>
    %225 = math.exp %224 : vector<16x16xf32>
    %cst_70 = arith.constant dense<0.000000e+00> : vector<16xf32>
    %226 = vector.multi_reduction <add>, %225, %cst_70 [1] : vector<16x16xf32> to vector<16xf32>
    %227 = vector.shape_cast %226 : vector<16xf32> to vector<16x1xf32>
    %cst_71 = arith.constant dense<0.000000e+00> : vector<16x8xf32>
    %228 = tpu.matmul %225, %217, %cst_71 {dimension_numbers = #tpu.dot_dimension_numbers<[1], [0], [0], [1], [0, 0, 1, 1], [], []>} : vector<16x16xf32>, vector<16x8xf32>, vector<16x8xf32> -> vector<16x8xf32>
    %229 = tpu.reciprocal %227 {approx = true} : vector<16x1xf32> -> vector<16x1xf32>
    %230 = vector.broadcast %229 : vector<16x1xf32> to vector<16x8xf32>
    %231 = arith.mulf %228, %230 : vector<16x8xf32>
    %232 = vector.extract_strided_slice %25 {offsets = [0, 24], sizes = [16, 8], strides = [1, 1]} : vector<32x32xf32> to vector<16x8xf32>
    %233 = vector.extract_strided_slice %27 {offsets = [16, 24], sizes = [16, 8], strides = [1, 1]} : vector<32x32xf32> to vector<16x8xf32>
    %234 = vector.extract_strided_slice %29 {offsets = [16, 24], sizes = [16, 8], strides = [1, 1]} : vector<32x32xf32> to vector<16x8xf32>
    %cst_72 = arith.constant 0.353553385 : f32
    %235 = vector.broadcast %cst_72 : f32 to vector<16x8xf32>
    %236 = arith.mulf %232, %235 : vector<16x8xf32>
    %cst_73 = arith.constant dense<0.000000e+00> : vector<16x16xf32>
    %237 = tpu.matmul %236, %233, %cst_73 {dimension_numbers = #tpu.dot_dimension_numbers<[1], [1], [0], [0], [0, 0, 1, 0], [], []>} : vector<16x8xf32>, vector<16x8xf32>, vector<16x16xf32> -> vector<16x16xf32>
    %cst_74 = arith.constant dense<0xFF800000> : vector<16xf32>
    %238 = vector.multi_reduction <maximumf>, %237, %cst_74 [1] : vector<16x16xf32> to vector<16xf32>
    %239 = vector.shape_cast %238 : vector<16xf32> to vector<16x1xf32>
    %240 = vector.broadcast %239 : vector<16x1xf32> to vector<16x16xf32>
    %241 = arith.subf %237, %240 : vector<16x16xf32>
    %242 = math.exp %241 : vector<16x16xf32>
    %cst_75 = arith.constant dense<0.000000e+00> : vector<16xf32>
    %243 = vector.multi_reduction <add>, %242, %cst_75 [1] : vector<16x16xf32> to vector<16xf32>
    %244 = vector.shape_cast %243 : vector<16xf32> to vector<16x1xf32>
    %cst_76 = arith.constant dense<0.000000e+00> : vector<16x8xf32>
    %245 = tpu.matmul %242, %234, %cst_76 {dimension_numbers = #tpu.dot_dimension_numbers<[1], [0], [0], [1], [0, 0, 1, 1], [], []>} : vector<16x16xf32>, vector<16x8xf32>, vector<16x8xf32> -> vector<16x8xf32>
    %246 = tpu.reciprocal %244 {approx = true} : vector<16x1xf32> -> vector<16x1xf32>
    %247 = vector.broadcast %246 : vector<16x1xf32> to vector<16x8xf32>
    %248 = arith.mulf %245, %247 : vector<16x8xf32>
    %249 = tpu.concatenate %231, %248 in 0 : vector<16x8xf32>, vector<16x8xf32> -> vector<32x8xf32>
    %250 = tpu.concatenate %49, %104, %159, %214 in 1 : vector<32x8xf32>, vector<32x8xf32>, vector<32x8xf32>, vector<32x8xf32> -> vector<32x32xf32>
    %251 = tpu.concatenate %84, %139, %194, %249 in 1 : vector<32x8xf32>, vector<32x8xf32>, vector<32x8xf32>, vector<32x8xf32> -> vector<32x32xf32>
    %cst_77 = arith.constant dense<0.000000e+00> : vector<32x32xf32>
    %252 = tpu.matmul %251, %16, %cst_77 {dimension_numbers = #tpu.dot_dimension_numbers<[1], [0], [0], [1], [0, 0, 1, 1], [], []>} : vector<32x32xf32>, vector<32x32xf32>, vector<32x32xf32> -> vector<32x32xf32>
    %cst_78 = arith.constant dense<0.000000e+00> : vector<32x32xf32>
    %253 = tpu.matmul %250, %17, %cst_78 {dimension_numbers = #tpu.dot_dimension_numbers<[1], [0], [0], [1], [0, 0, 1, 1], [], []>} : vector<32x32xf32>, vector<32x32xf32>, vector<32x32xf32> -> vector<32x32xf32>
    %254 = arith.addf %252, %253 : vector<32x32xf32>
    %255 = vector.broadcast %5 : vector<1x32xf32> to vector<32x32xf32>
    %256 = arith.addf %254, %255 : vector<32x32xf32>
    %c0_79 = arith.constant 0 : index
    %c0_80 = arith.constant 0 : index
    %c0_81 = arith.constant 0 : index
    %257 = vector.load %arg8[%c0_79, %c0_80, %c0_81] : memref<1x32x32xf32, #tpu.memory_space<vmem>>, vector<1x32x32xf32>
    %258 = vector.shape_cast %257 : vector<1x32x32xf32> to vector<32x32xf32>
    %259 = vector.shape_cast %256 : vector<32x32xf32> to vector<1x32x32xf32>
    tpu.vector_store %arg8[%c0_79, %c0_80, %c0_81], %259 {strides = array<i32>} : memref<1x32x32xf32, #tpu.memory_space<vmem>>, vector<1x32x32xf32>,
    return
  }
  func.func @transform_0(%arg0: i32) -> (i32, i32, i32) {
    %c0_i32 = arith.constant 0 : i32
    %c0_i32_0 = arith.constant 0 : i32
    %c0_i32_1 = arith.constant 0 : i32
    return %arg0, %c0_i32, %c0_i32_0 : i32, i32, i32
  }
  func.func @transform_1(%arg0: i32) -> (i32, i32, i32) {
    %c0_i32 = arith.constant 0 : i32
    %c0_i32_0 = arith.constant 0 : i32
    %c0_i32_1 = arith.constant 0 : i32
    %c0_i32_2 = arith.constant 0 : i32
    return %c0_i32, %c0_i32_0, %c0_i32_1 : i32, i32, i32
  }
  func.func @transform_2(%arg0: i32) -> (i32, i32, i32) {
    %c0_i32 = arith.constant 0 : i32
    %c0_i32_0 = arith.constant 0 : i32
    %c0_i32_1 = arith.constant 0 : i32
    %c0_i32_2 = arith.constant 0 : i32
    return %c0_i32, %c0_i32_0, %c0_i32_1 : i32, i32, i32
  }
  func.func @transform_3(%arg0: i32) -> (i32, i32) {
    %c0_i32 = arith.constant 0 : i32
    %c0_i32_0 = arith.constant 0 : i32
    %c0_i32_1 = arith.constant 0 : i32
    return %c0_i32, %c0_i32_0 : i32, i32
  }
  func.func @transform_4(%arg0: i32) -> (i32, i32) {
    %c0_i32 = arith.constant 0 : i32
    %c0_i32_0 = arith.constant 0 : i32
    %c0_i32_1 = arith.constant 0 : i32
    return %c0_i32, %c0_i32_0 : i32, i32
  }
  func.func @transform_5(%arg0: i32) -> (i32, i32) {
    %c0_i32 = arith.constant 0 : i32
    %c0_i32_0 = arith.constant 0 : i32
    %c0_i32_1 = arith.constant 0 : i32
    return %c0_i32, %c0_i32_0 : i32, i32
  }
  func.func @transform_6(%arg0: i32) -> (i32, i32) {
    %c0_i32 = arith.constant 0 : i32
    %c0_i32_0 = arith.constant 0 : i32
    %c0_i32_1 = arith.constant 0 : i32
    return %c0_i32, %c0_i32_0 : i32, i32
  }
  func.func @transform_7(%arg0: i32) -> (i32, i32, i32) {
    %c0_i32 = arith.constant 0 : i32
    %c0_i32_0 = arith.constant 0 : i32
    %c0_i32_1 = arith.constant 0 : i32
    return %arg0, %c0_i32, %c0_i32_0 : i32, i32, i32
  }
}

</mosaic_0001>

<bundles_post_ra>
// kernel: _lambda_.1
= control target key start
LH: loop header
LB: loop body
LE: loop exit
PB: predicated region body
PF: predicated region fallthrough
CT: control target
= control target key end

     0   :  { %12 = vsyncpa [#allocation3], 0  ;;  %s6296_s0 = inlined_call_operand.hbm [shape: f32[2,32,32], index: 0, kind: input, shape index: {}]   ;;  %s6297_s1 = inlined_call_operand.hbm [shape: f32[1,32,32], index: 1, kind: input, shape index: {}]   ;;  %s6298_s2 = inlined_call_operand.hbm [shape: f32[4,32,32], index: 2, kind: input, shape index: {}]   ;;  %s6299_s3 = inlined_call_operand.hbm [shape: f32[32,96], index: 3, kind: input, shape index: {}]   ;;  %s6300_s4 = inlined_call_operand.hbm [shape: f32[32,96], index: 4, kind: input, shape index: {}]   ;;  %s6301_s5 = inlined_call_operand.hbm [shape: f32[64,32], index: 5, kind: input, shape index: {}]   ;;  %s6302_s6 = inlined_call_operand.vmem [shape: f32[1,32], index: 6, kind: input, shape index: {}]   ;;  %s6303_s7 = inlined_call_operand.hbm [shape: f32[2,32,32], index: 7, kind: output, shape index: {}]  }
   0x1   :  { %14 = vsyncpa [#allocation3 + $0x1], 0 }
   0x2   :  { %15 = vsyncpa [#allocation6], 0 }
   0x3   :  { %16 = vsyncpa [#allocation9], 0 }
   0x4   :  { %17 = vsyncpa [#allocation12], 0 }
   0x5   :  { %18 = vsyncpa [#allocation4], 0 }
   0x6   :  { %20 = vsyncpa [#allocation4 + $0x1], 0  ;;  %s5255_s24 = smov 0   ;;  %s5257_s25 = smov 0  }
   0x7   :  { %s5259_s26 = smov 0   ;;  %s5261_s27 = smov 0  }
   0x8 LB: > { %s5191_s28 = smov [#allocation5]   ;;  %s5276_s30 = sadd.s32 4294967295, %s5189_s27   ;;  %s5189_s27 = sphi %s5261_s27, %s6348_s27   ;;  %s5185_s26 = sphi %s5259_s26, %s6347_s26   ;;  %s5181_s25 = sphi %s5257_s25, %s6346_s25   ;;  %s5177_s24 = sphi %s5255_s24, %s6345_s24  }
   0x9   : > { %s221_s29 = sshll.u32 %s5191_s28, 4  ;;  %p3765_p0 = scmp.ge.s32.totalorder %s5189_s27, 1  ;;  %s5281_s29 = int_to_ptr.vmem [resolvable:$true] %s221_s29 }
   0xa   : > { %p6304_p1 = scmp.eq.s32.totalorder %s5276_s30, 0  ;;  %p209_p2 = scmp.lt.s32.totalorder %s5189_s27, 3 }
   0xb   : > { %s5192_s9 = smov [#allocation8]   ;;  %s5193_s12 = smov [#allocation7]  }
   0xc   : > { %p5283_p3 = pnand %p3765_p0, %p209_p2  ;;  %s247_s10 = sshll.u32 %s5192_s9, 4  ;;  %s5296_s10 = int_to_ptr.vmem [resolvable:$true] %s247_s10 }
   0xd   : > { %s234_s13 = sshll.u32 %s5193_s12, 4  ;;  %s4941_s16 = scalar_lea.hbm %s6297_s1, 512  ;;  %s5298_s13 = int_to_ptr.vmem [resolvable:$true] %s234_s13 }
   0xe   : > { %s6308_s8 = scalar_select %p5283_p3, 1, 0 }
   0xf   : > { %p4563_p5 = pneg %p5283_p3  ;;  %p4942_p7 = scmp.ne.s32.totalorder %s6297_s1, %s4941_s16 }
  0x10   : > { %p4948_p11 = scmp.lt.u32.totalorder %s4941_s16, %s6297_s1 }
  0x11   : > { %p5292_p6 = pnand %p4563_p5, %p6304_p1 }
  0x13   : > { %p5308_p8 = pneg %p5292_p6 }
  0x15   : > { %p4944_p9 = pnand %p5308_p8, %p4942_p7 }
  0x17   : > { %p4945_p10 = pneg %p4944_p9 }
  0x19   : > { %p4950_p12 = pnand %p4948_p11, %p4945_p10 }
  0x1b   : > { %4953 = shalt.err (!%p4950_p12)
}
  0x1c   : > { %s4954_s22 = scalar_lea.vmem %s5281_s29, 512  ;;  %p4962_p5 = scmp.lt.s32.totalorder %s5281_s29, %s5281_s29 }
  0x1d   : > { %p4955_p13 = scmp.ne.s32.totalorder %s5281_s29, %s4954_s22  ;;  %p4963_p4 = scmp.lt.s32.totalorder %s4954_s22, %s4954_s22 }
  0x1f   : > { %p4957_p0 = pnand %p4955_p13, %p5308_p8  ;;  %p4964_p7 = por %p4963_p4, %p4962_p5 }
  0x21   : > { %p4958_p2 = pneg %p4957_p0 }
  0x23   : > { %p4965_p9 = pnand %p4964_p7, %p4958_p2 }
  0x25   : > { %4968 = shalt.err (!%p4965_p9)
}
  0x26   : > { %s6306_s23 = smov 128   ;;  %s5195_s28 = smov 8  }
  0x27   : > { %4566 = dma.hbm_to_vmem [thread:$0]  (!%p5292_p6), %s6297_s1, 512, %s5281_s29, [#allocation6], %s6306_s23, %s6306_s23, %s5195_s28  }
  0x28   : > { %s4969_s16 = scalar_lea.hbm %s6299_s3, 512 }
  0x29   : > { %p4970_p4 = scmp.ne.s32.totalorder %s6299_s3, %s4969_s16  ;;  %p4976_p12 = scmp.lt.u32.totalorder %s4969_s16, %s6299_s3 }
  0x2b   : > { %p4972_p10 = pnand %p4970_p4, %p5308_p8 }
  0x2d   : > { %p4973_p11 = pneg %p4972_p10 }
  0x2f   : > { %p4978_p13 = pnand %p4976_p12, %p4973_p11 }
  0x31   : > { %4981 = shalt.err (!%p4978_p13)
}
  0x32   : > { %s4982_s29 = scalar_lea.vmem %s5296_s10, 512  ;;  %p4990_p7 = scmp.lt.s32.totalorder %s5296_s10, %s5296_s10 }
  0x33   : > { %p4983_p0 = scmp.ne.s32.totalorder %s5296_s10, %s4982_s29  ;;  %p4991_p9 = scmp.lt.s32.totalorder %s4982_s29, %s4982_s29 }
  0x35   : > { %p4985_p2 = pnand %p4983_p0, %p5308_p8  ;;  %p4992_p4 = por %p4991_p9, %p4990_p7 }
  0x37   : > { %p4986_p5 = pneg %p4985_p2 }
  0x39   : > { %p4993_p10 = pnand %p4992_p4, %p4986_p5 }
  0x3b   : > { %4996 = shalt.err (!%p4993_p10)
}
  0x3c   : > { %4572 = dma.hbm_to_vmem [thread:$0]  (!%p5292_p6), %s6299_s3, 512, %s5296_s10, [#allocation9], %s6306_s23, %s6306_s23, %s5195_s28  }
  0x3d   : > { %s4997_s15 = scalar_lea.hbm %s6298_s2, 2048 }
  0x3e   : > { %p4998_p11 = scmp.ne.s32.totalorder %s6298_s2, %s4997_s15  ;;  %p5004_p0 = scmp.lt.u32.totalorder %s4997_s15, %s6298_s2 }
  0x40   : > { %p5000_p12 = pnand %p4998_p11, %p5308_p8 }
  0x42   : > { %p5001_p13 = pneg %p5000_p12 }
  0x44   : > { %p5006_p2 = pnand %p5004_p0, %p5001_p13 }
  0x46   : > { %5009 = shalt.err (!%p5006_p2)
}
  0x47   : > { %s5010_s10 = scalar_lea.vmem %s5298_s13, 2048  ;;  %p5018_p4 = scmp.lt.s32.totalorder %s5298_s13, %s5298_s13 }
  0x48   : > { %p5011_p5 = scmp.ne.s32.totalorder %s5298_s13, %s5010_s10  ;;  %p5019_p10 = scmp.lt.s32.totalorder %s5010_s10, %s5010_s10 }
  0x4a   : > { %p5013_p7 = pnand %p5011_p5, %p5308_p8  ;;  %p5020_p11 = por %p5019_p10, %p5018_p4 }
  0x4c   : > { %p5014_p9 = pneg %p5013_p7 }
  0x4e   : > { %p5021_p12 = pnand %p5020_p11, %p5014_p9 }
  0x50   : > { %5024 = shalt.err (!%p5021_p12)
}
  0x51   : > { %4569 = dma.hbm_to_vmem [thread:$0]  (!%p5292_p6), %s6298_s2, 2048, %s5298_s13, [#allocation6], %s6306_s23, %s6306_s23, %s5195_s28  }
  0x52   : > { %s5196_s22 = smov [#allocation10]   ;;  %s5197_s12 = smov [#allocation11]  }
  0x53   : > { %s260_s9 = sshll.u32 %s5196_s22, 4  ;;  %s273_s14 = sshll.u32 %s5197_s12, 4  ;;  %s261_s9 = int_to_ptr.vmem [resolvable:$true] %s260_s9  ;;  %s274_s14 = int_to_ptr.vmem [resolvable:$true] %s273_s14 }
  0x54   : > { %s5025_s17 = scalar_lea.hbm %s6300_s4, 512 }
  0x55   : > { %p5026_p13 = scmp.ne.s32.totalorder %s6300_s4, %s5025_s17  ;;  %p5032_p5 = scmp.lt.u32.totalorder %s5025_s17, %s6300_s4 }
  0x57   : > { %p5028_p0 = pnand %p5026_p13, %p5308_p8 }
  0x59   : > { %p5029_p2 = pneg %p5028_p0 }
  0x5b   : > { %p5034_p7 = pnand %p5032_p5, %p5029_p2 }
  0x5d   : > { %5037 = shalt.err (!%p5034_p7)
}
  0x5e   : > { %s5038_s13 = scalar_lea.vmem %s261_s9, 512  ;;  %p5046_p11 = scmp.lt.s32.totalorder %s261_s9, %s261_s9 }
  0x5f   : > { %p5039_p9 = scmp.ne.s32.totalorder %s261_s9, %s5038_s13  ;;  %p5047_p12 = scmp.lt.s32.totalorder %s5038_s13, %s5038_s13 }
  0x61   : > { %p5041_p4 = pnand %p5039_p9, %p5308_p8  ;;  %p5048_p1 = por %p5047_p12, %p5046_p11 }
  0x63   : > { %p5042_p10 = pneg %p5041_p4 }
  0x65   : > { %p5049_p3 = pnand %p5048_p1, %p5042_p10 }
  0x67   : > { %5052 = shalt.err (!%p5049_p3)
}
  0x68   : > { %4575 = dma.hbm_to_vmem [thread:$0]  (!%p5292_p6), %s6300_s4, 512, %s261_s9, [#allocation9], %s6306_s23, %s6306_s23, %s5195_s28  }
  0x69   : > { %s5053_s16 = scalar_lea.hbm %s6301_s5, 1024 }
  0x6a   : > { %p5054_p1 = scmp.ne.s32.totalorder %s6301_s5, %s5053_s16  ;;  %p5060_p0 = scmp.lt.u32.totalorder %s5053_s16, %s6301_s5 }
  0x6c   : > { %p5056_p3 = pnand %p5054_p1, %p5308_p8 }
  0x6e   : > { %p5057_p13 = pneg %p5056_p3 }
  0x70   : > { %p5062_p2 = pnand %p5060_p0, %p5057_p13 }
  0x72   : > { %5065 = shalt.err (!%p5062_p2)
}
  0x73   : > { %s5066_s21 = scalar_lea.vmem %s274_s14, 1024  ;;  %p5074_p4 = scmp.lt.s32.totalorder %s274_s14, %s274_s14 }
  0x74   : > { %p5067_p5 = scmp.ne.s32.totalorder %s274_s14, %s5066_s21  ;;  %p5075_p10 = scmp.lt.s32.totalorder %s5066_s21, %s5066_s21 }
  0x76   : > { %p5069_p7 = pnand %p5067_p5, %p5308_p8  ;;  %p5076_p11 = por %p5075_p10, %p5074_p4 }
  0x78   : > { %p5070_p9 = pneg %p5069_p7 }
  0x7a   : > { %p5077_p12 = pnand %p5076_p11, %p5070_p9 }
  0x7c   : > { %5080 = shalt.err (!%p5077_p12)
}
  0x7d   : > { %4578 = dma.hbm_to_vmem [thread:$0]  (!%p5292_p6), %s6301_s5, 1024, %s274_s14, [#allocation12], %s6306_s23, %s6306_s23, %s5195_s28  }
  0x7e   : > { %s3764_s11 = sadd.s32 4294967294, %s5189_s27   ;;  %s5428_s19 = sadd.s32 1, %s5189_s27  }
  0x7f   : > { %s33_s29 = sadd.s32 1, %s5185_s26  ;;  %s30_s22 = ssub.s32 %s5189_s27, %s5428_s19 }
  0x80   : > { %p40_p8 = scmp.ne.s32.totalorder %s5185_s26, %s5181_s25  ;;  %p31_p1 = scmp.eq.s32.totalorder %s30_s22, 0 }
  0x81   : > { %p41_p3 = scmp.eq.s32.totalorder %s5189_s27, 0  ;;  %p46_p13 = scmp.ne.s32.totalorder %s5181_s25, %s5177_s24 }
  0x82   : > { %p196_p0 = scmp.eq.s32.totalorder %s5276_s30, 1  ;;  %p6311_p5 = scmp.eq.s32.totalorder %s5276_s30, 0 }
  0x83   : > { %s5440_s12 = scalar_select %p31_p1, %s5185_s26, %s33_s29  }
  0x84   : > { %p42_p2 = por %p41_p3, %p40_p8  ;;  %p5444_p7 = por %p6311_p5, %p46_p13 }
  0x85   : > { %p5448_p6 = por %p196_p0, %p40_p8  ;;  %p202_p9 = scmp.eq.s32.totalorder %s3764_s11, 1 }
  0x86   : > { %p4592_p4 = scmp.lt.s32.totalorder %s5189_s27, 2  ;;  %s290_s16 = sand.u32 1, %s5185_s26  }
  0x87   : > { %s6313_s14 = scalar_select %p5448_p6, 1, 0 }
  0x88   : > { %p5454_p10 = por %p202_p9, %p46_p13  ;;  %s3772_s18 = sshll.u32 %s290_s16, 5 }
  0x89   : > { %s3901_s20 = sshll.u32 %s5189_s27, 9  ;;  %s294_s13 = scalar_lea.vmem [#allocation2], %s3772_s18 }
  0x8a   : > { %s6314_s17 = scalar_select %p5454_p10, 1, 0 }
  0x8b   : > { %s5462_s9 = scalar_lea.hbm %s6296_s0, %s3901_s20  ;;  %s301_s29 = sshll.u32 %s294_s13, 4  ;;  %s5468_s29 = int_to_ptr.vmem [resolvable:$true] %s301_s29 }
  0x8c   : > { %p5464_p11 = pnand %p4592_p4, %p42_p2  ;;  %s5470_s22 = scalar_lea.sflag [#allocation3], %s290_s16 }
  0x8d   : > { %s5081_s23 = scalar_lea.hbm %s5462_s9, 512  ;;  %s5086_s10 = scalar_lea.hbm %s6296_s0, 1024 }
  0x8e   : > { %p5082_p12 = scmp.ne.s32.totalorder %s5462_s9, %s5081_s23  ;;  %p5083_p8 = pneg %p5464_p11 }
  0x8f   : > { %p5087_p13 = scmp.lt.u32.totalorder %s5462_s9, %s6296_s0  ;;  %p5088_p0 = scmp.lt.u32.totalorder %s5086_s10, %s5081_s23 }
  0x90   : > { %p5084_p1 = pnand %p5083_p8, %p5082_p12  ;;  %p5090_p5 = scmp.lt.u32.totalorder %s5081_s23, %s5462_s9 }
  0x91   : > { %p5089_p2 = por %p5088_p0, %p5087_p13 }
  0x92   : > { %p5085_p3 = pneg %p5084_p1 }
  0x93   : > { %p5091_p9 = por %p5090_p5, %p5089_p2 }
  0x95   : > { %p5092_p4 = pnand %p5091_p9, %p5085_p3 }
  0x97   : > { %5095 = shalt.err (!%p5092_p4)
}
  0x98   : > { %s5096_s16 = scalar_lea.vmem %s5468_s29, 512  ;;  %s5198_s18 = smov [#allocation2]  }
  0x99   : > { %p5097_p12 = scmp.ne.s32.totalorder %s5468_s29, %s5096_s16  ;;  %s5101_s20 = sshll.u32 %s5198_s18, 4  ;;  %s5102_s20 = int_to_ptr.vmem [resolvable:$false] %s5101_s20 }
  0x9a   : > { %s5103_s21 = scalar_lea.vmem %s5102_s20, 1024  ;;  %p5104_p6 = scmp.lt.s32.totalorder %s5468_s29, %s5102_s20 }
  0x9b   : > { %p5099_p1 = pnand %p5097_p12, %p5083_p8  ;;  %p5105_p13 = scmp.lt.s32.totalorder %s5103_s21, %s5096_s16 }
  0x9d   : > { %p5100_p10 = pneg %p5099_p1  ;;  %p5106_p0 = por %p5105_p13, %p5104_p6 }
  0x9f   : > { %p5107_p2 = pnand %p5106_p0, %p5100_p10 }
  0xa1   : > { %5110 = shalt.err (!%p5107_p2)
}
  0xa2   : > { %s6316_s23 = smov 128   ;;  %p6317_p8 = scmp.ne.s32.totalorder %s6308_s8, 0 }
  0xa3   : > { %4582 = dma.hbm_to_vmem [thread:$0]  (!%p5464_p11), %s5462_s9, 512, %s5468_s29, %s5470_s22, %s6316_s23, %s6316_s23, %s5195_s28  }
  0xa4   : > { %313 = sbr.rel (%p6317_p8) target bundleno = 3180 (0xc6c), region = 48 }
  0xab   : > { %s5504_s10 = sand.u32 1, %s5181_s25  }
  0xac   : > { %s3776_s13 = sshll.u32 %s5504_s10, 5  ;;  %s316_s16 = scalar_lea.sflag [#allocation3], %s5504_s10 }
  0xad   : > { %s5510_s11 = scalar_lea.vmem [#allocation2], %s3776_s13 }
  0xae   : > { %5156 = dma.done.wait (%p5444_p7), %s316_s16, 512  }
  0xaf   : > { %5158 = vsyncadd (%p5444_p7), %s316_s16, 4294966784  ;;  %p6318_p6 = scmp.eq.s32.totalorder %s5276_s30, 0 }
  0xb1   : > { %5160 = dma.done.wait (%p6318_p6), [#allocation6], 2560   ;;  %p6319_p10 = pmov %p6318_p6 }
  0xb2   : > { %p6320_p11 = pmov %p6318_p6 }
  0xb3   : > { %5162 = vsyncadd (%p6319_p10), [#allocation6], 4294964736 }
  0xb4   : > { %5164 = dma.done.wait (%p6320_p11), [#allocation9], 1024   ;;  %p6321_p3 = pmov %p6318_p6 }
  0xb6   : > { %5166 = vsyncadd (%p6321_p3), [#allocation9], 4294966272  ;;  %p6322_p5 = pmov %p6321_p3 }
  0xb7   : > { %p6323_p9 = pmov %p6321_p3 }
  0xb8   : > { %5168 = dma.done.wait (%p6322_p5), [#allocation12], 1024  }
  0xb9   : > { %5170 = vsyncadd (%p6323_p9), [#allocation12], 4294966272  ;;  %vm407_vm0 = vcmask 261120   ;;  %v403_v0 = vld [vmem:[#allocation8] sm:$0xff]  ;;  %v404_v1 = vld [vmem:[#allocation8 + $0x8] sm:$0xff]  ;;  %vm626_vm1 = vcmask 64512  }
  0xba   : > { %v405_v2 = vld [vmem:[#allocation8 + $0x10] sm:$0xff]  ;;  %v4343_v3 = vpack.c.bf16 %v404_v1, %v403_v0  ;;  %v406_v4 = vld [vmem:[#allocation8 + $0x18] sm:$0xff]  ;;  %v370_v5 = vld [vmem:[%s5510_s11] sm:$0xff]  ;;  %s5199_s8 = smov 64   ;;  %s5200_s28 = smov 96   ;;  %vm978_vm3 = vcmask 130048  }
  0xbb   : > { %v4347_v6 = vpack.c.bf16 %v406_v4, %v405_v2  ;;  %4071 = vmatprep.mubr.msk.f32.mxu1 %vm407_vm0, %v370_v5  ;;  %v509_v7 = vld [vmem:[#allocation10] sm:$0xff]  ;;  %v510_v8 = vld [vmem:[#allocation10 + $0x8] sm:$0xff]  ;;  %v511_v10 = vld [vmem:[#allocation10 + $0x10] sm:$0xff]  ;;  %s5201_s15 = smov 88   ;;  %s5202_s9 = smov 120   ;;  %vm3356_vm4 = vcmask 195584  }
  0xbc   : > { %4344 = vmatprep.subr.bf16.mxu1 %v4343_v3  ;;  %v4351_v9 = vpack.c.bf16 %v510_v8, %v509_v7  ;;  %v512_v11 = vld [vmem:[#allocation10 + $0x18] sm:$0xff]  ;;  %v371_v12 = vld [vmem:[%s5510_s11 + $0x8] sm:$0xff]  ;;  %v374_v13 = vld [vmem:[#allocation5] sm:$0xff]  ;;  %s5203_s29 = smov 56   ;;  %s5204_s22 = smov 80  }
  0xbd   : > { %4346 = vmatpush3.bf16.msra.mxu1 %v4343_v3  ;;  %v372_v14 = vld [vmem:[%s5510_s11 + $0x10] sm:$0xff]  ;;  %v4355_v15 = vpack.c.bf16 %v512_v11, %v511_v10  ;;  %v505_v16 = vadd.f32 %v374_v13, %v370_v5  ;;  %v375_v17 = vld [vmem:[#allocation5 + $0x8] sm:$0xff]  ;;  %v373_v18 = vld [vmem:[%s5510_s11 + $0x18] sm:$0xff]  ;;  %s5205_s18 = smov 112   ;;  %s5206_s20 = smov 72  }
  0xbe   : > { %4348 = vmatprep.subr.bf16.mxu1 %v4347_v6  ;;  %v376_v19 = vld [vmem:[#allocation5 + $0x10] sm:$0xff]  ;;  %v506_v20 = vadd.f32 %v375_v17, %v371_v12  ;;  %v377_v22 = vld [vmem:[#allocation5 + $0x18] sm:$0xff]  ;;  %vm5568_vm2 = vmpackc.low %vm626_vm1, %vm626_vm1  ;;  %s5207_s21 = smov 104   ;;  %s5208_s23 = smov 48  }
  0xbf   : > { %v507_v21 = vadd.f32 %v376_v19, %v372_v14  ;;  %v508_v23 = vadd.f32 %v377_v22, %v373_v18  ;;  %v379_v3 = vld [vmem:[#allocation7 + $0x8] sm:$0xff]  ;;  %v378_v5 = vld [vmem:[#allocation7] sm:$0xff]  ;;  %v380_v10 = vld [vmem:[#allocation7 + $0x10] sm:$0xff]  ;;  %s5209_s16 = smov 40   ;;  %s5210_s11 = smov 8  }
  0xc0   : > { %v381_v11 = vld [vmem:[#allocation7 + $0x18] sm:$0xff]  ;;  %p6342_p4 = scmp.ne.s32.totalorder %s6313_s14, 0 }
  0xc1   : > { %4350 = vmatpush3.bf16.msra.mxu1 %v4347_v6 }
  0xc2   : > { %4352 = vmatprep.subr.bf16.mxu1 %v4351_v9 }
  0xc4   : > { %4072 = vmatmul.mubr.msk.f32.vlgmr.msra.gmra.mrb[0].mxu1 %vm407_vm0, %v371_v12 }
  0xc5   : > { %4074 = vmatprep.mubr.msk.f32.mxu1 %vm407_vm0, %v372_v14  ;;  %4354 = vmatpush3.bf16.msra.mxu1 %v4351_v9 }
  0xc6   : > { %4356 = vmatprep.subr.bf16.mxu1 %v4355_v15 }
  0xc8   : > { %4075 = vmatmul.mubr.msk.f32.gmra.mrb[2].mxu1 %vm407_vm0, %v373_v18 }
  0xc9   : > { %4358 = vmatpush3.bf16.msra.mxu1 %v4355_v15  ;;  %4085 = vmatprep.mubr.msk.f32.mxu1 %vm407_vm0, %v505_v16 }
  0xcc   : > { %4086 = vmatmul.mubr.msk.f32.vlgmr.msra.gmra.mrb[4].mxu1 %vm407_vm0, %v506_v20 }
  0xcd   : > { %4088 = vmatprep.mubr.msk.f32.mxu1 %vm407_vm0, %v507_v21 }
  0xd0   : > { %4089 = vmatmul.mubr.msk.f32.gmra.mrb[6].mxu1 %vm407_vm0, %v508_v23 }
 0x197   : > { %v4073_v24 = vpop.f32.mrb[0].mxu1 }
 0x198   : > { %v486_v25 = vpop.f32.mrb[1].mxu1  ;;  %v5587_v62 = vmul.f32 0.35355338, %v4073_v24 }
 0x199   : > { %v5540_v26 = vpack.i.bf16 %v4073_v24, %v486_v25  ;;  %v5542_v27 = vmul.f32 0.35355338, %v486_v25 }
 0x19b   : > { %4664 = vrot.lane.b32.xlu1 %v5540_v26, %s5199_s8  ;;  %4654 = vrot.lane.b32.xlu0 %v5540_v26, %s5200_s28  ;;  %v4076_v28 = vpop.f32.mrb[2].mxu1 }
 0x19c   : > { %4099 = vmatprep.mubr.msk.f32.mxu0 %vm626_vm1, %v5542_v27  ;;  %v496_v29 = vpop.f32.mrb[3].mxu1  ;;  %v5599_v1 = vmul.f32 0.35355338, %v4076_v28 }
 0x19d   : > { %v5549_v30 = vpack.i.bf16 %v4076_v28, %v496_v29  ;;  %v5589_v63 = vmul.f32 0.35355338, %v496_v29 }
 0x19f   : > { %4669 = vrot.lane.b32.xlu1 %v5549_v30, %s5199_s8  ;;  %4659 = vrot.lane.b32.xlu0 %v5549_v30, %s5200_s28  ;;  %v4087_v31 = vpop.f32.mrb[4].mxu1 }
 0x1a0   : > { %v591_v32 = vpop.f32.mrb[5].mxu1  ;;  %v5603_v2 = vmul.f32 0.35355338, %v4087_v31 }
 0x1a1   : > { %v5554_v33 = vpack.i.bf16 %v4087_v31, %v591_v32  ;;  %v5597_v0 = vmul.f32 0.35355338, %v591_v32 }
 0x1a3   : > { %4674 = vrot.lane.b32.xlu1 %v5554_v33, %s5200_s28  ;;  %v5557_v34 = vpop.f32.mrb[6].mxu1 }
 0x1a4   : > { %v5559_v35 = vpop.f32.mrb[7].mxu1 }
 0x1a5   : > { %v5563_v36 = vpack.i.bf16 %v5557_v34, %v5559_v35 }
 0x1a7   : > { %4679 = vrot.lane.b32.xlu1 %v5563_v36, %s5200_s28  ;;  %s5212_s28 = smov 24  }
 0x20d   : > { %v4665_v37 = vpop.permute.xlu1 %4664  ;;  %v4655_v38 = vpop.permute.xlu0 %4654 }
 0x20e   : > { %v4667_v39 = vunpack.i.h.bf16 %v4665_v37  ;;  %v4666_v40 = vunpack.i.l.bf16 %v4665_v37  ;;  %v4657_v41 = vunpack.i.h.bf16 %v4655_v38  ;;  %v4656_v42 = vunpack.i.l.bf16 %v4655_v38 }
 0x210   : > { %v4359_v44 = vpack.c.bf16 %v4657_v41, %v4656_v42  ;;  %v4371_v45 = vpack.c.bf16 %v4667_v39, %v4666_v40 }
 0x211   : > { %v4670_v46 = vpop.permute.xlu1 %4669  ;;  %v4660_v47 = vpop.permute.xlu0 %4659 }
 0x212   : > { %4361 = vmatprep.subr.msk.bf16.mxu0 %vm5568_vm2, %v4359_v44  ;;  %4372 = vmatprep.subr.bf16.mxu1 %v4371_v45  ;;  %v4672_v48 = vunpack.i.h.bf16 %v4670_v46  ;;  %v4671_v49 = vunpack.i.l.bf16 %v4670_v46  ;;  %v4662_v50 = vunpack.i.h.bf16 %v4660_v47  ;;  %v4661_v51 = vunpack.i.l.bf16 %v4660_v47 }
 0x213   : > { %4364 = vmatpush3.bf16.xpose.msk.msra.mxu0 %vm5568_vm2, %v4359_v44  ;;  %4374 = vmatpush3.bf16.msra.mxu1 %v4371_v45 }
 0x214   : > { %v4365_v52 = vpack.c.bf16 %v4662_v50, %v4661_v51  ;;  %v4375_v53 = vpack.c.bf16 %v4672_v48, %v4671_v49 }
 0x215   : > { %v4675_v54 = vpop.permute.xlu1 %4674 }
 0x216   : > { %4376 = vmatprep.subr.bf16.mxu1 %v4375_v53  ;;  %4367 = vmatprep.subr.msk.bf16.mxu0 %vm5568_vm2, %v4365_v52  ;;  %v4677_v55 = vunpack.i.h.bf16 %v4675_v54  ;;  %v4676_v56 = vunpack.i.l.bf16 %v4675_v54 }
 0x217   : > { %4378 = vmatpush3.bf16.msra.mxu1 %v4375_v53 }
 0x218   : > { %v5578_v57 = vpack.c.bf16 %v4677_v55, %v4676_v56 }
 0x219   : > { %v4680_v58 = vpop.permute.xlu1 %4679 }
 0x21a   : > { %v4682_v59 = vunpack.i.h.bf16 %v4680_v58  ;;  %v4681_v60 = vunpack.i.l.bf16 %v4680_v58  ;;  %4381 = vmatprep.subr.msk.bf16.mxu1 %vm5568_vm2, %v5578_v57 }
 0x21b   : > { %4370 = vmatpush3.bf16.xpose.msk.msra.mxu0 %vm5568_vm2, %v4365_v52 }
 0x21c   : > { %v4389_v61 = vpack.c.bf16 %v4682_v59, %v4681_v60  ;;  %v5662_v59 = vmul.f32 0.35355338, %v5559_v35 }
 0x21e   : > { %4391 = vmatprep.subr.msk.bf16.mxu0 %vm5568_vm2, %v4389_v61 }
 0x222   : > { %4100 = vmatmul.mubr.msk.f32.vlgmr.msra.gmra.mrb[0].mxu0 %vm626_vm1, %v5587_v62 }
 0x223   : > { %4102 = vmatprep.mubr.msk.f32.mxu0 %vm626_vm1, %v5589_v63  ;;  %4394 = vmatpush3.bf16.xpose.msk.msra.mxu0 %vm5568_vm2, %v4389_v61 }
 0x226   : > { %4103 = vmatmul.mubr.msk.f32.gmra.mrb[2].mxu0 %vm626_vm1, %v5599_v1 }
 0x227   : > { %4137 = vmatprep.mubr.msk.f32.mxu0 %vm626_vm1, %v5597_v0 }
 0x22a   : > { %4138 = vmatmul.mubr.msk.f32.vlgmr.msra.gmra.mrb[4].mxu0 %vm626_vm1, %v5603_v2 }
 0x2f5   : > { %v4101_v4 = vpop.f32.mrb[0].mxu0 }
 0x2f6   : > { %v719_v6 = vadd.f32 %v4101_v4, %v379_v3  ;;  %v713_v7 = vpop.f32.mrb[1].mxu0 }
 0x2f7   : > { %v714_v8 = vadd.f32 %v713_v7, %v378_v5 }
 0x2f8   : > { %v735_v9 = vsel %vm407_vm0, %v719_v6, -inf }
 0x2f9   : > { %v4104_v12 = vpop.f32.mrb[2].mxu0  ;;  %736 = vmax.xlane.f32.xlu1 %v735_v9  ;;  %v732_v16 = vsel %vm407_vm0, %v714_v8, -inf }
 0x2fa   : > { %v723_v13 = vpop.f32.mrb[3].mxu0  ;;  %v729_v15 = vadd.f32 %v4104_v12, %v381_v11 }
 0x2fb   : > { %v724_v14 = vadd.f32 %v723_v13, %v380_v10  ;;  %v382_v10 = vld [vmem:[#allocation7 + $0x20] sm:$0xff] }
 0x2fc   : > { %v741_v20 = vsel %vm407_vm0, %v729_v15, -inf }
 0x2fd   : > { %733 = vmax.xlane.f32.xlu1 %v732_v16  ;;  %v738_v17 = vsel %vm407_vm0, %v724_v14, -inf  ;;  %v5612_v18 = vpop.f32.mrb[4].mxu0  ;;  %v385_v16 = vld [vmem:[#allocation7 + $0x38] sm:$0xff] }
 0x2fe   : > { %739 = vmax.xlane.f32.xlu0 %v738_v17  ;;  %v5614_v19 = vpop.f32.mrb[5].mxu0  ;;  %v1184_v21 = vsel %vm978_vm3, %v5612_v18, -inf }
 0x2ff   : > { %v1181_v22 = vsel %vm978_vm3, %v5614_v19, -inf }
 0x301   : > { %742 = vmax.xlane.f32.xlu1 %v741_v20  ;;  %v384_v20 = vld [vmem:[#allocation7 + $0x30] sm:$0xff] }
 0x312   : > { %4689 = vrot.lane.b32.xlu1 %v5549_v30, %s5201_s15 }
 0x314   : > { %4684 = vrot.lane.b32.xlu0 %v5540_v26, %s5201_s15 }
 0x316   : > { %1290 = vrot.lane.b32.xlu1 %v5542_v27, %s5202_s9 }
 0x31a   : > { %1292 = vrot.lane.b32.xlu1 %v5587_v62, %s5202_s9 }
 0x31e   : > { %1294 = vrot.lane.b32.xlu1 %v5589_v63, %s5202_s9 }
 0x322   : > { %1296 = vrot.lane.b32.xlu1 %v5599_v1, %s5202_s9 }
 0x326   : > { %4694 = vrot.lane.b32.xlu1 %v5554_v33, %s5199_s8 }
 0x333   : > { %1185 = vmax.xlane.f32.xlu0 %v1184_v21 }
 0x337   : > { %1182 = vmax.xlane.f32.xlu0 %v1181_v22 }
 0x386   : > { %v737_v23 = vpop.xlane.xlu1 %736 }
 0x387   : > { %v745_v24 = vsub.f32 %v719_v6, %v737_v23 }
 0x389   : > { %v750_v25 = vmul.f32 1.442695, %v745_v24 }
 0x38a   : > { %v734_v28 = vpop.xlane.xlu1 %733 }
 0x38b   : > { %v744_v29 = vsub.f32 %v714_v8, %v734_v28  ;;  %v740_v31 = vpop.xlane.xlu0 %739  ;;  %4813 = vpow2.f32 %v750_v25  ;;  %v383_v8 = vld [vmem:[#allocation7 + $0x28] sm:$0xff] }
 0x38c   : > { %v746_v32 = vsub.f32 %v724_v14, %v740_v31 }
 0x38d   : > { %v748_v37 = vmul.f32 1.442695, %v744_v29 }
 0x38e   : > { %v752_v38 = vmul.f32 1.442695, %v746_v32  ;;  %v743_v39 = vpop.xlane.xlu1 %742 }
 0x38f   : > { %4815 = vpow2.f32 %v748_v37  ;;  %v747_v40 = vsub.f32 %v729_v15, %v743_v39  ;;  %v4685_v41 = vpop.permute.xlu0 %4684 }
 0x390   : > { %4817 = vpow2.f32 %v752_v38  ;;  %v4687_v42 = vunpack.i.h.bf16 %v4685_v41  ;;  %v4686_v44 = vunpack.i.l.bf16 %v4685_v41 }
 0x391   : > { %v754_v45 = vmul.f32 1.442695, %v747_v40 }
 0x392   : > { %v4399_v46 = vpack.c.bf16 %v4687_v42, %v4686_v44  ;;  %v4690_v47 = vpop.permute.xlu1 %4689 }
 0x393   : > { %4819 = vpow2.f32 %v754_v45  ;;  %v4692_v48 = vunpack.i.h.bf16 %v4690_v47  ;;  %v4691_v49 = vunpack.i.l.bf16 %v4690_v47 }
 0x394   : > { %4401 = vmatprep.subr.msk.bf16.mxu0 %vm5568_vm2, %v4399_v46 }
 0x395   : > { %v4405_v50 = vpack.c.bf16 %v4692_v48, %v4691_v49  ;;  %4404 = vmatpush3.bf16.xpose.msk.msra.mxu0 %vm5568_vm2, %v4399_v46  ;;  %v5642_v52 = vpop.eup %4813 }
 0x396   : > { %v1291_v51 = vpop.permute.xlu1 %1290 }
 0x397   : > { %4407 = vmatprep.subr.msk.bf16.mxu0 %vm5568_vm2, %v4405_v50  ;;  %4155 = vmatprep.mubr.msk.f32.mxu0 %vm626_vm1, %v1291_v51 }
 0x399   : > { %v5644_v53 = vpop.eup %4815 }
 0x39a   : > { %v5646_v54 = vpop.eup %4817  ;;  %4113 = vmatprep.mubr.msk.f32.mxu1 %vm407_vm0, %v5644_v53  ;;  %v1293_v55 = vpop.permute.xlu1 %1292 }
 0x39b   : > { %4114 = vmatmul.mubr.msk.f32.vlgmr.msra.gmra.mrb[8].mxu1 %vm407_vm0, %v5642_v52 }
 0x39c   : > { %4384 = vmatpush3.bf16.xpose.msk.msra.mxu1 %vm5568_vm2, %v5578_v57  ;;  %4116 = vmatprep.mubr.msk.f32.mxu1 %vm407_vm0, %v5646_v54  ;;  %v5669_v57 = vmul.f32 0.35355338, %v5557_v34 }
 0x39d   : > { %v5657_v56 = vpop.eup %4819  ;;  %4410 = vmatpush3.bf16.xpose.msk.msra.mxu0 %vm5568_vm2, %v4405_v50 }
 0x39e   : > { %v1295_v58 = vpop.permute.xlu1 %1294 }
 0x39f   : > { %4117 = vmatmul.mubr.msk.f32.gmra.mrb[10].mxu1 %vm407_vm0, %v5657_v56 }
 0x3a0   : > { %4123 = vmatprep.mubr.msk.f32.mxu1 %vm626_vm1, %v5662_v59 }
 0x3a2   : > { %v1297_v60 = vpop.permute.xlu1 %1296 }
 0x3a3   : > { %4124 = vmatmul.mubr.msk.f32.vlgmr.msra.gmra.mrb[12].mxu1 %vm626_vm1, %v5669_v57 }
 0x3a4   : > { %4156 = vmatmul.mubr.msk.f32.vlgmr.msra.gmra.mrb[6].mxu0 %vm626_vm1, %v1293_v55 }
 0x3a5   : > { %4158 = vmatprep.mubr.msk.f32.mxu0 %vm626_vm1, %v1295_v58 }
 0x3a6   : > { %v4695_v61 = vpop.permute.xlu1 %4694 }
 0x3a7   : > { %v4697_v35 = vunpack.i.h.bf16 %v4695_v61  ;;  %v4696_v3 = vunpack.i.l.bf16 %v4695_v61 }
 0x3a8   : > { %4159 = vmatmul.mubr.msk.f32.gmra.mrb[8].mxu0 %vm626_vm1, %v1297_v60 }
 0x3a9   : > { %v4385_v4 = vpack.c.bf16 %v4697_v35, %v4696_v3 }
 0x3ab   : > { %4386 = vmatprep.subr.bf16.mxu1 %v4385_v4 }
 0x3ac   : > { %4388 = vmatpush3.bf16.msra.mxu1 %v4385_v4 }
 0x3c0   : > { %v1186_v37 = vpop.xlane.xlu0 %1185 }
 0x3c1   : > { %v1188_v48 = vsub.f32 %v5612_v18, %v1186_v37 }
 0x3c3   : > { %v1191_v4 = vmul.f32 1.442695, %v1188_v48 }
 0x3c4   : > { %v1183_v38 = vpop.xlane.xlu0 %1182 }
 0x3c5   : > { %v1187_v44 = vsub.f32 %v5614_v19, %v1183_v38 }
 0x3c7   : > { %v1189_v50 = vmul.f32 1.442695, %v1187_v44 }
 0x46e   : > { %v5676_v5 = vpop.f32.mrb[8].mxu1 }
 0x46f   : > { %6326 = vst [vmem:[#allocation19_spill] sm:$0xff] %v5676_v5  ;;  %v5678_v34 = vpop.f32.mrb[9].mxu1 }
 0x470   : > { %6327 = vst [vmem:[#allocation20_spill] sm:$0xff] %v5678_v34 }
 0x472   : > { %v5680_v6 = vpop.f32.mrb[10].mxu1 }
 0x473   : > { %6328 = vst [vmem:[#allocation21_spill] sm:$0xff] %v5680_v6  ;;  %v5682_v7 = vpop.f32.mrb[11].mxu1 }
 0x474   : > { %6329 = vst [vmem:[#allocation22_spill] sm:$0xff] %v5682_v7 }
 0x476   : > { %v4125_v9 = vpop.f32.mrb[12].mxu1 }
 0x477   : > { %v969_v11 = vpop.f32.mrb[13].mxu1  ;;  %v4157_v12 = vpop.f32.mrb[6].mxu0  ;;  %v982_v32 = vsel %vm978_vm3, %v4125_v9, -inf }
 0x478   : > { %v5684_v13 = vadd.f32 %v4157_v12, %v383_v8  ;;  %v1388_v14 = vpop.f32.mrb[7].mxu0  ;;  %v979_v31 = vsel %vm978_vm3, %v969_v11, -inf }
 0x479   : > { %v1389_v15 = vadd.f32 %v1388_v14, %v382_v10 }
 0x47a   : > { %v1410_v17 = vsel %vm407_vm0, %v5684_v13, -inf }
 0x47b   : > { %v4160_v21 = vpop.f32.mrb[8].mxu0  ;;  %1411 = vmax.xlane.f32.xlu0 %v1410_v17  ;;  %v1407_v22 = vsel %vm407_vm0, %v1389_v15, -inf }
 0x47c   : > { %v5689_v23 = vadd.f32 %v4160_v21, %v385_v16  ;;  %v1398_v24 = vpop.f32.mrb[9].mxu0  ;;  %1408 = vmax.xlane.f32.xlu1 %v1407_v22 }
 0x47d   : > { %v5691_v25 = vadd.f32 %v1398_v24, %v384_v20 }
 0x47e   : > { %v1416_v28 = vsel %vm407_vm0, %v5689_v23, -inf }
 0x47f   : > { %1417 = vmax.xlane.f32.xlu0 %v1416_v28  ;;  %v1413_v29 = vsel %vm407_vm0, %v5691_v25, -inf }
 0x480   : > { %1414 = vmax.xlane.f32.xlu1 %v1413_v29 }
 0x483   : > { %980 = vmax.xlane.f32.xlu0 %v979_v31 }
 0x484   : > { %983 = vmax.xlane.f32.xlu1 %v982_v32 }
 0x495   : > { %4704 = vrot.lane.b32.xlu1 %v5540_v26, %s5203_s29 }
 0x499   : > { %4709 = vrot.lane.b32.xlu1 %v5549_v30, %s5203_s29  ;;  %4699 = vrot.lane.b32.xlu0 %v5563_v36, %s5199_s8  ;;  %s5211_s8 = smov 16  }
 0x49d   : > { %4719 = vrot.lane.b32.xlu1 %v5554_v33, %s5201_s15  ;;  %4714 = vrot.lane.b32.xlu0 %v5563_v36, %s5201_s15 }
 0x4a1   : > { %1760 = vrot.lane.b32.xlu1 %v5597_v0, %s5202_s9  ;;  %4724 = vrot.lane.b32.xlu0 %v5540_v26, %s5204_s22 }
 0x4a5   : > { %1762 = vrot.lane.b32.xlu1 %v5603_v2, %s5202_s9  ;;  %1560 = vrot.lane.b32.xlu0 %v5662_v59, %s5202_s9 }
 0x4a9   : > { %4729 = vrot.lane.b32.xlu1 %v5549_v30, %s5204_s22  ;;  %1562 = vrot.lane.b32.xlu0 %v5669_v57, %s5202_s9 }
 0x4ad   : > { %1962 = vrot.lane.b32.xlu1 %v5587_v62, %s5205_s18  ;;  %1960 = vrot.lane.b32.xlu0 %v5542_v27, %s5205_s18 }
 0x4b1   : > { %1966 = vrot.lane.b32.xlu1 %v5599_v1, %s5205_s18  ;;  %1964 = vrot.lane.b32.xlu0 %v5589_v63, %s5205_s18 }
 0x508   : > { %v1412_v39 = vpop.xlane.xlu0 %1411 }
 0x509   : > { %v1409_v40 = vpop.xlane.xlu1 %1408  ;;  %v1420_v18 = vsub.f32 %v5684_v13, %v1412_v39 }
 0x50a   : > { %v1419_v51 = vsub.f32 %v1389_v15, %v1409_v40 }
 0x50b   : > { %v1425_v28 = vmul.f32 1.442695, %v1420_v18 }
 0x50c   : > { %v1418_v41 = vpop.xlane.xlu0 %1417  ;;  %v1423_v8 = vmul.f32 1.442695, %v1419_v51 }
 0x50d   : > { %v1415_v42 = vpop.xlane.xlu1 %1414  ;;  %v1422_v29 = vsub.f32 %v5689_v23, %v1418_v41 }
 0x50f   : > { %v1429_v41 = vmul.f32 1.442695, %v1422_v29  ;;  %v387_v29 = vld [vmem:[#allocation7 + $0x48] sm:$0xff] }
 0x510   : > { %v981_v45 = vpop.xlane.xlu0 %980 }
 0x511   : > { %v985_v46 = vsub.f32 %v969_v11, %v981_v45  ;;  %v984_v47 = vpop.xlane.xlu1 %983 }
 0x512   : > { %v986_v49 = vsub.f32 %v4125_v9, %v984_v47  ;;  %v1421_v9 = vsub.f32 %v5691_v25, %v1415_v42 }
 0x513   : > { %v987_v55 = vmul.f32 1.442695, %v985_v46 }
 0x514   : > { %v989_v58 = vmul.f32 1.442695, %v986_v49  ;;  %v4700_v60 = vpop.permute.xlu0 %4699  ;;  %v1427_v31 = vmul.f32 1.442695, %v1421_v9 }
 0x515   : > { %4821 = vpow2.f32 %v987_v55  ;;  %v4702_v61 = vunpack.i.h.bf16 %v4700_v60  ;;  %v4701_v35 = vunpack.i.l.bf16 %v4700_v60  ;;  %v4705_v3 = vpop.permute.xlu1 %4704 }
 0x516   : > { %4823 = vpow2.f32 %v989_v58  ;;  %v4707_v17 = vunpack.i.h.bf16 %v4705_v3  ;;  %v4706_v20 = vunpack.i.l.bf16 %v4705_v3 }
 0x517   : > { %4825 = vpow2.f32 %v1189_v50  ;;  %v4395_v19 = vpack.c.bf16 %v4702_v61, %v4701_v35 }
 0x518   : > { %v4715_v10 = vpop.permute.xlu0 %4714  ;;  %4827 = vpow2.f32 %v1191_v4  ;;  %v4411_v23 = vpack.c.bf16 %v4707_v17, %v4706_v20 }
 0x519   : > { %v4717_v11 = vunpack.i.h.bf16 %v4715_v10  ;;  %v4716_v12 = vunpack.i.l.bf16 %v4715_v10  ;;  %v4710_v14 = vpop.permute.xlu1 %4709  ;;  %4396 = vmatprep.subr.bf16.mxu1 %v4395_v19  ;;  %4829 = vpow2.f32 %v1423_v8 }
 0x51a   : > { %v4712_v39 = vunpack.i.h.bf16 %v4710_v14  ;;  %v4711_v40 = vunpack.i.l.bf16 %v4710_v14  ;;  %4831 = vpow2.f32 %v1425_v28 }
 0x51b   : > { %v4429_v15 = vpack.c.bf16 %v4717_v11, %v4716_v12  ;;  %4833 = vpow2.f32 %v1427_v31  ;;  %v386_v31 = vld [vmem:[#allocation7 + $0x40] sm:$0xff] }
 0x51c   : > { %v4725_v16 = vpop.permute.xlu0 %4724  ;;  %v4415_v50 = vpack.c.bf16 %v4712_v39, %v4711_v40  ;;  %4835 = vpow2.f32 %v1429_v41 }
 0x51d   : > { %v4727_v21 = vunpack.i.h.bf16 %v4725_v16  ;;  %v4726_v22 = vunpack.i.l.bf16 %v4725_v16  ;;  %v4720_v24 = vpop.permute.xlu1 %4719  ;;  %4431 = vmatprep.subr.msk.bf16.mxu0 %vm5568_vm2, %v4429_v15 }
 0x51e   : > { %4434 = vmatpush3.bf16.xpose.msk.msra.mxu0 %vm5568_vm2, %v4429_v15  ;;  %v4722_v47 = vunpack.i.h.bf16 %v4720_v24  ;;  %v4721_v48 = vunpack.i.l.bf16 %v4720_v24 }
 0x51f   : > { %v5738_v13 = vpop.eup %4821  ;;  %v4439_v25 = vpack.c.bf16 %v4727_v21, %v4726_v22 }
 0x520   : > { %v5740_v32 = vpop.eup %4823  ;;  %4130 = vmatprep.mubr.msk.f32.mxu1 %vm978_vm3, %v5738_v13  ;;  %v1561_v37 = vpop.permute.xlu0 %1560  ;;  %v4419_v55 = vpack.c.bf16 %v4722_v47, %v4721_v48 }
 0x521   : > { %v5744_v38 = vpop.eup %4825  ;;  %v1761_v42 = vpop.permute.xlu1 %1760  ;;  %4131 = vmatmul.mubr.msk.f32.vlgmr.msra.gmra.mrb[14].mxu1 %vm978_vm3, %v5740_v32  ;;  %4441 = vmatprep.subr.msk.bf16.mxu0 %vm5568_vm2, %v4439_v25 }
 0x522   : > { %4398 = vmatpush3.bf16.msra.mxu1 %v4395_v19  ;;  %4144 = vmatprep.mubr.msk.f32.mxu1 %vm978_vm3, %v5744_v38  ;;  %v5753_v44 = vpop.eup %4827 }
 0x523   : > { %4412 = vmatprep.subr.bf16.mxu1 %v4411_v23  ;;  %4193 = vmatprep.mubr.msk.f32.mxu0 %vm626_vm1, %v1761_v42  ;;  %v5755_v46 = vpop.eup %4829  ;;  %v389_v42 = vld [vmem:[#allocation7 + $0x58] sm:$0xff] }
 0x524   : > { %v1563_v45 = vpop.permute.xlu0 %1562  ;;  %v5767_v35 = vpop.eup %4831 }
 0x525   : > { %v1763_v49 = vpop.permute.xlu1 %1762  ;;  %4145 = vmatmul.mubr.msk.f32.vlgmr.msra.gmra.mrb[16].mxu1 %vm978_vm3, %v5753_v44  ;;  %v5769_v4 = vpop.eup %4833 }
 0x526   : > { %4414 = vmatpush3.bf16.msra.mxu1 %v4411_v23  ;;  %4169 = vmatprep.mubr.msk.f32.mxu1 %vm407_vm0, %v5755_v46  ;;  %v5777_v8 = vpop.eup %4835 }
 0x527   : > { %4416 = vmatprep.subr.bf16.mxu1 %v4415_v50  ;;  %4194 = vmatmul.mubr.msk.f32.vlgmr.msra.gmra.mrb[10].mxu0 %vm626_vm1, %v1763_v49 }
 0x528   : > { %4444 = vmatpush3.bf16.xpose.msk.msra.mxu0 %vm5568_vm2, %v4439_v25  ;;  %v1961_v51 = vpop.permute.xlu0 %1960 }
 0x529   : > { %v4730_v58 = vpop.permute.xlu1 %4729  ;;  %4211 = vmatprep.mubr.msk.f32.mxu0 %vm626_vm1, %v1961_v51 }
 0x52a   : > { %v4732_v60 = vunpack.i.h.bf16 %v4730_v58  ;;  %v4731_v61 = vunpack.i.l.bf16 %v4730_v58  ;;  %4418 = vmatpush3.bf16.msra.mxu1 %v4415_v50 }
 0x52b   : > { %4421 = vmatprep.subr.msk.bf16.mxu1 %vm5568_vm2, %v4419_v55 }
 0x52c   : > { %v4445_v3 = vpack.c.bf16 %v4732_v60, %v4731_v61  ;;  %v1965_v10 = vpop.permute.xlu0 %1964 }
 0x52d   : > { %4170 = vmatmul.mubr.msk.f32.vlgmr.msra.gmra.mrb[18].mxu1 %vm407_vm0, %v5767_v35  ;;  %v1963_v19 = vpop.permute.xlu1 %1962 }
 0x52e   : > { %4172 = vmatprep.mubr.msk.f32.mxu1 %vm407_vm0, %v5769_v4  ;;  %4447 = vmatprep.subr.msk.bf16.mxu0 %vm5568_vm2, %v4445_v3 }
 0x530   : > { %4450 = vmatpush3.bf16.xpose.msk.msra.mxu0 %vm5568_vm2, %v4445_v3 }
 0x531   : > { %4173 = vmatmul.mubr.msk.f32.gmra.mrb[20].mxu1 %vm407_vm0, %v5777_v8  ;;  %v1967_v11 = vpop.permute.xlu1 %1966 }
 0x532   : > { %4179 = vmatprep.mubr.msk.f32.mxu1 %vm626_vm1, %v1561_v37 }
 0x533   : > { %4424 = vmatpush3.bf16.xpose.msk.msra.mxu1 %vm5568_vm2, %v4419_v55 }
 0x537   : > { %4212 = vmatmul.mubr.msk.f32.vlgmr.msra.gmra.mrb[12].mxu0 %vm626_vm1, %v1963_v19 }
 0x538   : > { %4214 = vmatprep.mubr.msk.f32.mxu0 %vm626_vm1, %v1965_v10 }
 0x53a   : > { %4180 = vmatmul.mubr.msk.f32.vlgmr.msra.gmra.mrb[22].mxu1 %vm626_vm1, %v1563_v45  ;;  %v388_v45 = vld [vmem:[#allocation7 + $0x50] sm:$0xff] }
 0x53b   : > { %4215 = vmatmul.mubr.msk.f32.gmra.mrb[14].mxu0 %vm626_vm1, %v1967_v11 }
 0x5f4   : > { %v5790_v12 = vpop.f32.mrb[14].mxu1 }
 0x5f5   : > { %6330 = vst [vmem:[#allocation23_spill] sm:$0xff] %v5790_v12  ;;  %v5792_v14 = vpop.f32.mrb[15].mxu1 }
 0x5f6   : > { %6331 = vst [vmem:[#allocation24_spill] sm:$0xff] %v5792_v14 }
 0x5f8   : > { %v5794_v18 = vpop.f32.mrb[16].mxu1 }
 0x5f9   : > { %6332 = vst [vmem:[#allocation25_spill] sm:$0xff] %v5794_v18  ;;  %v5796_v9 = vpop.f32.mrb[17].mxu1 }
 0x5fa   : > { %6333 = vst [vmem:[#allocation26_spill] sm:$0xff] %v5796_v9  ;;  %v5798_v15 = vpop.f32.mrb[10].mxu0 }
 0x5fb   : > { %v5800_v16 = vpop.f32.mrb[11].mxu0  ;;  %v1854_v21 = vsel %vm978_vm3, %v5798_v15, -inf }
 0x5fc   : > { %v1851_v17 = vsel %vm978_vm3, %v5800_v16, -inf }
 0x5fd   : > { %1852 = vmax.xlane.f32.xlu0 %v1851_v17 }
 0x600   : > { %v5804_v20 = vpop.f32.mrb[18].mxu1 }
 0x601   : > { %1855 = vmax.xlane.f32.xlu0 %v1854_v21  ;;  %v5808_v22 = vpop.f32.mrb[19].mxu1 }
 0x604   : > { %v5810_v24 = vpop.f32.mrb[20].mxu1 }
 0x605   : > { %v5812_v28 = vpop.f32.mrb[21].mxu1 }
 0x60a   : > { %v4213_v25 = vpop.f32.mrb[12].mxu0 }
 0x60b   : > { %v5814_v37 = vadd.f32 %v4213_v25, %v387_v29  ;;  %v2058_v39 = vpop.f32.mrb[13].mxu0 }
 0x60c   : > { %v5816_v40 = vadd.f32 %v2058_v39, %v386_v31 }
 0x60d   : > { %v5818_v23 = vpop.f32.mrb[22].mxu1  ;;  %v2080_v41 = vsel %vm407_vm0, %v5814_v37, -inf }
 0x60e   : > { %v4216_v47 = vpop.f32.mrb[14].mxu0  ;;  %2081 = vmax.xlane.f32.xlu0 %v2080_v41  ;;  %v1642_v48 = vpop.f32.mrb[23].mxu1  ;;  %v2077_v49 = vsel %vm407_vm0, %v5816_v40, -inf  ;;  %v1654_v3 = vsel %vm978_vm3, %v5818_v23, -inf }
 0x60f   : > { %v5824_v50 = vadd.f32 %v4216_v47, %v389_v42  ;;  %v2068_v51 = vpop.f32.mrb[15].mxu0  ;;  %2078 = vmax.xlane.f32.xlu1 %v2077_v49  ;;  %v1651_v61 = vsel %vm978_vm3, %v1642_v48, -inf }
 0x610   : > { %v5826_v55 = vadd.f32 %v2068_v51, %v388_v45 }
 0x611   : > { %v2086_v58 = vsel %vm407_vm0, %v5824_v50, -inf }
 0x612   : > { %2087 = vmax.xlane.f32.xlu0 %v2086_v58  ;;  %v2083_v60 = vsel %vm407_vm0, %v5826_v55, -inf }
 0x613   : > { %2084 = vmax.xlane.f32.xlu1 %v2083_v60 }
 0x616   : > { %1652 = vmax.xlane.f32.xlu0 %v1651_v61 }
 0x624   : > { %4734 = vrot.lane.b32.xlu1 %v5554_v33, %s5203_s29 }
 0x62c   : > { %4739 = vrot.lane.b32.xlu0 %v5563_v36, %s5203_s29  ;;  %s369_s29 = scalar_lea.vmem [#allocation13], %s3776_s13 }
 0x630   : > { %4754 = vrot.lane.b32.xlu0 %v5563_v36, %s5204_s22 }
 0x634   : > { %4764 = vrot.lane.b32.xlu0 %v5540_v26, %s5206_s20 }
 0x638   : > { %2230 = vrot.lane.b32.xlu0 %v5662_v59, %s5205_s18 }
 0x63c   : > { %2232 = vrot.lane.b32.xlu0 %v5669_v57, %s5205_s18 }
 0x640   : > { %2630 = vrot.lane.b32.xlu0 %v5542_v27, %s5207_s21 }
 0x644   : > { %2634 = vrot.lane.b32.xlu0 %v5589_v63, %s5207_s21 }
 0x648   : > { %1655 = vmax.xlane.f32.xlu1 %v1654_v3 }
 0x659   : > { %4744 = vrot.lane.b32.xlu1 %v5540_v26, %s5208_s23 }
 0x65d   : > { %4749 = vrot.lane.b32.xlu1 %v5549_v30, %s5208_s23 }
 0x661   : > { %4759 = vrot.lane.b32.xlu1 %v5554_v33, %s5204_s22  ;;  %s3643_s22 = sshll.u32 %s369_s29, 4  ;;  %s6244_s22 = int_to_ptr.vmem [resolvable:$true] %s3643_s22 }
 0x665   : > { %2430 = vrot.lane.b32.xlu1 %v5597_v0, %s5205_s18 }
 0x669   : > { %2432 = vrot.lane.b32.xlu1 %v5603_v2, %s5205_s18  ;;  %s3902_s18 = sshll.u32 %s5276_s30, 9  ;;  %s3630_s30 = scalar_lea.sflag [#allocation4], %s5504_s10 }
 0x66a   : > { %s6249_s13 = scalar_lea.hbm %s6303_s7, %s3902_s18 }
 0x66d   : > { %4769 = vrot.lane.b32.xlu1 %v5549_v30, %s5206_s20 }
 0x671   : > { %2632 = vrot.lane.b32.xlu1 %v5587_v62, %s5207_s21 }
 0x675   : > { %2636 = vrot.lane.b32.xlu1 %v5599_v1, %s5207_s21 }
 0x68a   : > { %v1853_v27 = vpop.xlane.xlu0 %1852 }
 0x68e   : > { %v1856_v63 = vpop.xlane.xlu0 %1855 }
 0x69b   : > { %v2082_v19 = vpop.xlane.xlu0 %2081 }
 0x69c   : > { %v2079_v10 = vpop.xlane.xlu1 %2078 }
 0x69f   : > { %v5867_v11 = vpop.xlane.xlu0 %2087 }
 0x6a0   : > { %v2085_v17 = vpop.xlane.xlu1 %2084 }
 0x6a3   : > { %v1653_v21 = vpop.xlane.xlu0 %1652 }
 0x6a4   : > { %v1657_v29 = vsub.f32 %v1642_v48, %v1653_v21  ;;  %v4735_v31 = vpop.permute.xlu1 %4734 }
 0x6a5   : > { %v4737_v25 = vunpack.i.h.bf16 %v4735_v31  ;;  %v4736_v39 = vunpack.i.l.bf16 %v4735_v31  ;;  %v1857_v31 = vsub.f32 %v5800_v16, %v1853_v27  ;;  %v2091_v16 = vsub.f32 %v5826_v55, %v2085_v17 }
 0x6a6   : > { %v1659_v42 = vmul.f32 1.442695, %v1657_v29 }
 0x6a7   : > { %v4740_v41 = vpop.permute.xlu0 %4739  ;;  %v4425_v45 = vpack.c.bf16 %v4737_v25, %v4736_v39  ;;  %v1858_v39 = vsub.f32 %v5798_v15, %v1856_v63 }
 0x6a8   : > { %4837 = vpow2.f32 %v1659_v42  ;;  %v4742_v62 = vunpack.i.h.bf16 %v4740_v41  ;;  %v4741_v47 = vunpack.i.l.bf16 %v4740_v41  ;;  %v1859_v41 = vmul.f32 1.442695, %v1857_v31 }
 0x6a9   : > { %4426 = vmatprep.subr.bf16.mxu1 %v4425_v45 }
 0x6aa   : > { %v4435_v1 = vpack.c.bf16 %v4742_v62, %v4741_v47  ;;  %4428 = vmatpush3.bf16.msra.mxu1 %v4425_v45  ;;  %v2089_v45 = vsub.f32 %v5816_v40, %v2079_v10  ;;  %v2092_v40 = vsub.f32 %v5824_v50, %v5867_v11  ;;  %v2097_v10 = vmul.f32 1.442695, %v2091_v16 }
 0x6ab   : > { %v4755_v49 = vpop.permute.xlu0 %4754 }
 0x6ac   : > { %v4757_v51 = vunpack.i.h.bf16 %v4755_v49  ;;  %v4756_v58 = vunpack.i.l.bf16 %v4755_v49  ;;  %4436 = vmatprep.subr.bf16.mxu1 %v4435_v1  ;;  %v1861_v49 = vmul.f32 1.442695, %v1858_v39  ;;  %v2099_v55 = vmul.f32 1.442695, %v2092_v40 }
 0x6ae   : > { %v4469_v60 = vpack.c.bf16 %v4757_v51, %v4756_v58  ;;  %v2093_v51 = vmul.f32 1.442695, %v2089_v45 }
 0x6af   : > { %v4765_v61 = vpop.permute.xlu0 %4764 }
 0x6b0   : > { %v4767_v3 = vunpack.i.h.bf16 %v4765_v61  ;;  %v4766_v48 = vunpack.i.l.bf16 %v4765_v61  ;;  %4471 = vmatprep.subr.msk.bf16.mxu0 %vm5568_vm2, %v4469_v60 }
 0x6b1   : > { %4474 = vmatpush3.bf16.xpose.msk.msra.mxu0 %vm5568_vm2, %v4469_v60  ;;  %v2090_v60 = vsub.f32 %v5814_v37, %v2082_v19 }
 0x6b2   : > { %v5873_v21 = vpop.eup %4837  ;;  %v4479_v29 = vpack.c.bf16 %v4767_v3, %v4766_v48 }
 0x6b3   : > { %4186 = vmatprep.mubr.msk.f32.mxu1 %vm978_vm3, %v5873_v21  ;;  %v2231_v27 = vpop.permute.xlu0 %2230  ;;  %v2095_v61 = vmul.f32 1.442695, %v2090_v60 }
 0x6b4   : > { %4481 = vmatprep.subr.msk.bf16.mxu0 %vm5568_vm2, %v4479_v29 }
 0x6b7   : > { %v2233_v31 = vpop.permute.xlu0 %2232 }
 0x6d5   : > { %v1656_v25 = vpop.xlane.xlu1 %1655 }
 0x6d6   : > { %v1658_v42 = vsub.f32 %v5818_v23, %v1656_v25 }
 0x6d8   : > { %v1661_v62 = vmul.f32 1.442695, %v1658_v42 }
 0x6d9   : > { %v4745_v47 = vpop.permute.xlu1 %4744 }
 0x6da   : > { %4839 = vpow2.f32 %v1661_v62  ;;  %v4747_v15 = vunpack.i.h.bf16 %v4745_v47  ;;  %v4746_v63 = vunpack.i.l.bf16 %v4745_v47 }
 0x6db   : > { %4841 = vpow2.f32 %v1859_v41 }
 0x6dc   : > { %4843 = vpow2.f32 %v1861_v49  ;;  %v4451_v25 = vpack.c.bf16 %v4747_v15, %v4746_v63 }
 0x6dd   : > { %v4750_v58 = vpop.permute.xlu1 %4749  ;;  %4845 = vpow2.f32 %v2093_v51 }
 0x6de   : > { %v4752_v39 = vunpack.i.h.bf16 %v4750_v58  ;;  %v4751_v37 = vunpack.i.l.bf16 %v4750_v58  ;;  %4847 = vpow2.f32 %v2095_v61 }
 0x6df   : > { %4849 = vpow2.f32 %v2097_v10 }
 0x6e0   : > { %v4455_v17 = vpack.c.bf16 %v4752_v39, %v4751_v37  ;;  %4851 = vpow2.f32 %v2099_v55 }
 0x6e1   : > { %v4760_v23 = vpop.permute.xlu1 %4759 }
 0x6e2   : > { %v4762_v42 = vunpack.i.h.bf16 %v4760_v23  ;;  %v4761_v41 = vunpack.i.l.bf16 %v4760_v23 }
 0x6e4   : > { %v5887_v3 = vpop.eup %4839  ;;  %v4459_v62 = vpack.c.bf16 %v4762_v42, %v4761_v41  ;;  %v391_v41 = vld [vmem:[#allocation7 + $0x68] sm:$0xff] }
 0x6e5   : > { %v5889_v48 = vpop.eup %4841  ;;  %v2431_v19 = vpop.permute.xlu1 %2430  ;;  %4187 = vmatmul.mubr.msk.f32.vlgmr.msra.gmra.mrb[24].mxu1 %vm978_vm3, %v5887_v3 }
 0x6e6   : > { %4438 = vmatpush3.bf16.msra.mxu1 %v4435_v1  ;;  %4200 = vmatprep.mubr.msk.f32.mxu1 %vm978_vm3, %v5889_v48  ;;  %v5896_v50 = vpop.eup %4843  ;;  %v2631_v1 = vpop.permute.xlu0 %2630 }
 0x6e7   : > { %4452 = vmatprep.subr.bf16.mxu1 %v4451_v25  ;;  %4249 = vmatprep.mubr.msk.f32.mxu0 %vm626_vm1, %v2431_v19  ;;  %v5898_v11 = vpop.eup %4845 }
 0x6e8   : > { %v5910_v58 = vpop.eup %4847 }
 0x6e9   : > { %v2433_v45 = vpop.permute.xlu1 %2432  ;;  %4201 = vmatmul.mubr.msk.f32.vlgmr.msra.gmra.mrb[26].mxu1 %vm978_vm3, %v5896_v50  ;;  %v5912_v16 = vpop.eup %4849 }
 0x6ea   : > { %4454 = vmatpush3.bf16.msra.mxu1 %v4451_v25  ;;  %4225 = vmatprep.mubr.msk.f32.mxu1 %vm407_vm0, %v5898_v11  ;;  %v2635_v63 = vpop.permute.xlu0 %2634 }
 0x6eb   : > { %4456 = vmatprep.subr.bf16.mxu1 %v4455_v17  ;;  %4250 = vmatmul.mubr.msk.f32.vlgmr.msra.gmra.mrb[16].mxu0 %vm626_vm1, %v2433_v45  ;;  %v390_v45 = vld [vmem:[#allocation7 + $0x60] sm:$0xff] }
 0x6ec   : > { %4484 = vmatpush3.bf16.xpose.msk.msra.mxu0 %vm5568_vm2, %v4479_v29  ;;  %4267 = vmatprep.mubr.msk.f32.mxu0 %vm626_vm1, %v2631_v1  ;;  %v5920_v29 = vpop.eup %4851 }
 0x6ed   : > { %v4770_v47 = vpop.permute.xlu1 %4769 }
 0x6ee   : > { %v4772_v49 = vunpack.i.h.bf16 %v4770_v47  ;;  %v4771_v51 = vunpack.i.l.bf16 %v4770_v47  ;;  %4458 = vmatpush3.bf16.msra.mxu1 %v4455_v17 }
 0x6ef   : > { %4461 = vmatprep.subr.msk.bf16.mxu1 %vm5568_vm2, %v4459_v62 }
 0x6f0   : > { %v4485_v60 = vpack.c.bf16 %v4772_v49, %v4771_v51  ;;  %v393_v51 = vld [vmem:[#allocation7 + $0x78] sm:$0xff] }
 0x6f1   : > { %4226 = vmatmul.mubr.msk.f32.vlgmr.msra.gmra.mrb[28].mxu1 %vm407_vm0, %v5910_v58  ;;  %v2633_v15 = vpop.permute.xlu1 %2632 }
 0x6f2   : > { %4228 = vmatprep.mubr.msk.f32.mxu1 %vm407_vm0, %v5912_v16  ;;  %4487 = vmatprep.subr.msk.bf16.mxu0 %vm5568_vm2, %v4485_v60 }
 0x6f4   : > { %4490 = vmatpush3.bf16.xpose.msk.msra.mxu0 %vm5568_vm2, %v4485_v60 }
 0x6f5   : > { %4229 = vmatmul.mubr.msk.f32.gmra.mrb[30].mxu1 %vm407_vm0, %v5920_v29  ;;  %v2637_v23 = vpop.permute.xlu1 %2636 }
 0x6f6   : > { %4235 = vmatprep.mubr.msk.f32.mxu1 %vm626_vm1, %v2231_v27 }
 0x6f7   : > { %4464 = vmatpush3.bf16.xpose.msk.msra.mxu1 %vm5568_vm2, %v4459_v62 }
 0x6fb   : > { %4268 = vmatmul.mubr.msk.f32.vlgmr.msra.gmra.mrb[18].mxu0 %vm626_vm1, %v2633_v15 }
 0x6fc   : > { %4270 = vmatprep.mubr.msk.f32.mxu0 %vm626_vm1, %v2635_v63  ;;  %v392_v63 = vld [vmem:[#allocation7 + $0x70] sm:$0xff] }
 0x6fe   : > { %4236 = vmatmul.mubr.msk.f32.vlgmr.msra.gmra.mrb[32].mxu1 %vm626_vm1, %v2233_v31 }
 0x6ff   : > { %4271 = vmatmul.mubr.msk.f32.gmra.mrb[20].mxu0 %vm626_vm1, %v2637_v23 }
 0x7b8   : > { %v5933_v61 = vpop.f32.mrb[24].mxu1 }
 0x7b9   : > { %v5935_v40 = vpop.f32.mrb[25].mxu1 }
 0x7bc   : > { %v5937_v10 = vpop.f32.mrb[26].mxu1 }
 0x7bd   : > { %v5939_v27 = vpop.f32.mrb[27].mxu1 }
 0x7be   : > { %v5941_v25 = vpop.f32.mrb[16].mxu0 }
 0x7bf   : > { %v5943_v39 = vpop.f32.mrb[17].mxu0  ;;  %v2524_v31 = vsel %vm978_vm3, %v5941_v25, -inf }
 0x7c0   : > { %v2521_v37 = vsel %vm978_vm3, %v5943_v39, -inf }
 0x7c1   : > { %2522 = vmax.xlane.f32.xlu0 %v2521_v37 }
 0x7c4   : > { %v5947_v19 = vpop.f32.mrb[28].mxu1 }
 0x7c5   : > { %2525 = vmax.xlane.f32.xlu0 %v2524_v31  ;;  %v5951_v55 = vpop.f32.mrb[29].mxu1 }
 0x7c8   : > { %v5953_v17 = vpop.f32.mrb[30].mxu1 }
 0x7c9   : > { %v5955_v42 = vpop.f32.mrb[31].mxu1 }
 0x7ce   : > { %v4269_v1 = vpop.f32.mrb[18].mxu0 }
 0x7cf   : > { %v5957_v62 = vadd.f32 %v4269_v1, %v391_v41  ;;  %v2728_v47 = vpop.f32.mrb[19].mxu0 }
 0x7d0   : > { %v5959_v49 = vadd.f32 %v2728_v47, %v390_v45 }
 0x7d1   : > { %v5961_v60 = vpop.f32.mrb[32].mxu1  ;;  %v2750_v15 = vsel %vm407_vm0, %v5957_v62, -inf }
 0x7d2   : > { %v4272_v23 = vpop.f32.mrb[20].mxu0  ;;  %2751 = vmax.xlane.f32.xlu0 %v2750_v15  ;;  %v2312_v37 = vpop.f32.mrb[33].mxu1  ;;  %v2747_v31 = vsel %vm407_vm0, %v5959_v49, -inf }
 0x7d3   : > { %v5967_v6 = vadd.f32 %v4272_v23, %v393_v51  ;;  %v2738_v41 = vpop.f32.mrb[21].mxu0  ;;  %2748 = vmax.xlane.f32.xlu1 %v2747_v31  ;;  %v2321_v15 = vsel %vm978_vm3, %v2312_v37, -inf  ;;  %v2324_v51 = vsel %vm978_vm3, %v5961_v60, -inf }
 0x7d4   : > { %v5969_v1 = vadd.f32 %v2738_v41, %v392_v63 }
 0x7d5   : > { %v2756_v45 = vsel %vm407_vm0, %v5967_v6, -inf }
 0x7d6   : > { %2757 = vmax.xlane.f32.xlu0 %v2756_v45  ;;  %v2753_v47 = vsel %vm407_vm0, %v5969_v1, -inf }
 0x7d7   : > { %2754 = vmax.xlane.f32.xlu1 %v2753_v47 }
 0x7da   : > { %2322 = vmax.xlane.f32.xlu0 %v2321_v15 }
 0x7e8   : > { %4774 = vrot.lane.b32.xlu1 %v5554_v33, %s5208_s23 }
 0x7f0   : > { %4779 = vrot.lane.b32.xlu0 %v5563_v36, %s5208_s23  ;;  %s5111_s23 = scalar_lea.vmem %s6244_s22, 512 }
 0x7f1   : > { %p5112_p7 = scmp.ne.s32.totalorder %s6244_s22, %s5111_s23 }
 0x7f3   : > { %p5113_p12 = pnand %p5112_p7, %p6342_p4 }
 0x7f4   : > { %4794 = vrot.lane.b32.xlu0 %v5554_v33, %s5206_s20 }
 0x7f5   : > { %p5114_p1 = pneg %p5113_p12 }
 0x7f8   : > { %2900 = vrot.lane.b32.xlu0 %v5662_v59, %s5207_s21 }
 0x7fc   : > { %3100 = vrot.lane.b32.xlu0 %v5597_v0, %s5207_s21 }
 0x80c   : > { %2325 = vmax.xlane.f32.xlu1 %v2324_v51 }
 0x81d   : > { %4784 = vrot.lane.b32.xlu1 %v5540_v26, %s5209_s16 }
 0x821   : > { %4789 = vrot.lane.b32.xlu1 %v5549_v30, %s5209_s16 }
 0x825   : > { %4799 = vrot.lane.b32.xlu1 %v5563_v36, %s5206_s20 }
 0x829   : > { %2902 = vrot.lane.b32.xlu1 %v5669_v57, %s5207_s21 }
 0x82d   : > { %3102 = vrot.lane.b32.xlu1 %v5603_v2, %s5207_s21 }
 0x84e   : > { %v2523_v0 = vpop.xlane.xlu0 %2522 }
 0x84f   : > { %v2527_v59 = vsub.f32 %v5943_v39, %v2523_v0 }
 0x852   : > { %v2526_v63 = vpop.xlane.xlu0 %2525 }
 0x853   : > { %v2528_v23 = vsub.f32 %v5941_v25, %v2526_v63 }
 0x85f   : > { %v2752_v31 = vpop.xlane.xlu0 %2751 }
 0x860   : > { %v2749_v26 = vpop.xlane.xlu1 %2748 }
 0x863   : > { %v2758_v41 = vpop.xlane.xlu0 %2757 }
 0x864   : > { %v2755_v45 = vpop.xlane.xlu1 %2754 }
 0x865   : > { %v2761_v34 = vsub.f32 %v5969_v1, %v2755_v45 }
 0x867   : > { %v2323_v30 = vpop.xlane.xlu0 %2322 }
 0x868   : > { %v2327_v47 = vsub.f32 %v2312_v37, %v2323_v30  ;;  %v4775_v15 = vpop.permute.xlu1 %4774  ;;  %v2529_v30 = vmul.f32 1.442695, %v2527_v59  ;;  %v2762_v59 = vsub.f32 %v5967_v6, %v2758_v41 }
 0x869   : > { %v4777_v51 = vunpack.i.h.bf16 %v4775_v15  ;;  %v4776_v7 = vunpack.i.l.bf16 %v4775_v15  ;;  %v2531_v15 = vmul.f32 1.442695, %v2528_v23 }
 0x86a   : > { %v2329_v18 = vmul.f32 1.442695, %v2327_v47  ;;  %v2769_v1 = vmul.f32 1.442695, %v2762_v59 }
 0x86b   : > { %v4465_v57 = vpack.c.bf16 %v4777_v51, %v4776_v7  ;;  %v4780_v5 = vpop.permute.xlu0 %4779 }
 0x86c   : > { %4853 = vpow2.f32 %v2329_v18  ;;  %v4782_v2 = vunpack.i.h.bf16 %v4780_v5  ;;  %v4781_v12 = vunpack.i.l.bf16 %v4780_v5  ;;  %v2759_v5 = vsub.f32 %v5959_v49, %v2749_v26 }
 0x86d   : > { %4466 = vmatprep.subr.bf16.mxu1 %v4465_v57 }
 0x86e   : > { %v4475_v39 = vpack.c.bf16 %v4782_v2, %v4781_v12  ;;  %4468 = vmatpush3.bf16.msra.mxu1 %v4465_v57  ;;  %v2763_v51 = vmul.f32 1.442695, %v2759_v5  ;;  %v2760_v2 = vsub.f32 %v5957_v62, %v2752_v31 }
 0x86f   : > { %v4795_v0 = vpop.permute.xlu0 %4794 }
 0x870   : > { %4476 = vmatprep.subr.bf16.mxu1 %v4475_v39  ;;  %v4796_v31 = vunpack.i.l.bf16 %v4795_v0 }
 0x873   : > { %v6000_v25 = vpop.permute.xlu0 %2900 }
 0x876   : > { %v6002_v63 = vpop.eup %4853 }
 0x877   : > { %4242 = vmatprep.mubr.msk.f32.mxu1 %vm978_vm3, %v6002_v63  ;;  %v3101_v37 = vpop.permute.xlu0 %3100 }
 0x878   : > { %4305 = vmatprep.mubr.msk.f32.mxu0 %vm626_vm1, %v3101_v37 }
 0x899   : > { %v2326_v7 = vpop.xlane.xlu1 %2325 }
 0x89a   : > { %v2328_v18 = vsub.f32 %v5961_v60, %v2326_v7  ;;  %v2765_v60 = vmul.f32 1.442695, %v2760_v2  ;;  %v2767_v7 = vmul.f32 1.442695, %v2761_v34 }
 0x89c   : > { %v2331_v12 = vmul.f32 1.442695, %v2328_v18 }
 0x89d   : > { %v4785_v47 = vpop.permute.xlu1 %4784 }
 0x89e   : > { %4855 = vpow2.f32 %v2331_v12  ;;  %v4787_v37 = vunpack.i.h.bf16 %v4785_v47  ;;  %v4786_v9 = vunpack.i.l.bf16 %v4785_v47 }
 0x89f   : > { %4857 = vpow2.f32 %v2529_v30 }
 0x8a0   : > { %4859 = vpow2.f32 %v2531_v15  ;;  %v4491_v5 = vpack.c.bf16 %v4787_v37, %v4786_v9  ;;  %v4797_v9 = vunpack.i.h.bf16 %v4795_v0 }
 0x8a1   : > { %v4790_v57 = vpop.permute.xlu1 %4789  ;;  %4861 = vpow2.f32 %v2763_v51 }
 0x8a2   : > { %v4792_v12 = vunpack.i.h.bf16 %v4790_v57  ;;  %v4791_v62 = vunpack.i.l.bf16 %v4790_v57  ;;  %4863 = vpow2.f32 %v2765_v60  ;;  %v4499_v45 = vpack.c.bf16 %v4797_v9, %v4796_v31 }
 0x8a3   : > { %4865 = vpow2.f32 %v2767_v7  ;;  %v1434_v9 = vsel %vm407_vm0, %v5767_v35, 0.0  ;;  %v2101_v31 = vsel %vm407_vm0, %v5898_v11, 0.0  ;;  %v1440_v35 = vsel %vm407_vm0, %v5777_v8, 0.0 }
 0x8a4   : > { %v4495_v41 = vpack.c.bf16 %v4792_v12, %v4791_v62  ;;  %4867 = vpow2.f32 %v2769_v1  ;;  %v2107_v11 = vsel %vm407_vm0, %v5912_v16, 0.0  ;;  %v1666_v8 = vsel %vm978_vm3, %v5887_v3, 0.0 }
 0x8a5   : > { %v4800_v14 = vpop.permute.xlu1 %4799  ;;  %v2333_v16 = vsel %vm978_vm3, %v6002_v63, 0.0 }
 0x8a6   : > { %v4802_v49 = vunpack.i.h.bf16 %v4800_v14  ;;  %v4801_v26 = vunpack.i.l.bf16 %v4800_v14 }
 0x8a8   : > { %v6012_v23 = vpop.eup %4855  ;;  %v4509_v18 = vpack.c.bf16 %v4802_v49, %v4801_v26 }
 0x8a9   : > { %v6014_v30 = vpop.eup %4857  ;;  %4243 = vmatmul.mubr.msk.f32.vlgmr.msra.gmra.mrb[34].mxu1 %vm978_vm3, %v6012_v23  ;;  %v2903_v6 = vpop.permute.xlu1 %2902 }
 0x8aa   : > { %4478 = vmatpush3.bf16.msra.mxu1 %v4475_v39  ;;  %4256 = vmatprep.mubr.msk.f32.mxu1 %vm978_vm3, %v6014_v30  ;;  %v6022_v34 = vpop.eup %4859  ;;  %v2533_v3 = vsel %vm978_vm3, %v6014_v30, 0.0 }
 0x8ab   : > { %4492 = vmatprep.subr.bf16.mxu1 %v4491_v5  ;;  %4511 = vmatprep.subr.msk.bf16.mxu0 %vm5568_vm2, %v4509_v18  ;;  %v4862_v14 = vpop.eup %4861  ;;  %v2536_v63 = vsel %vm978_vm3, %v6022_v34, 0.0 }
 0x8ac   : > { %4514 = vmatpush3.bf16.xpose.msk.msra.mxu0 %vm5568_vm2, %v4509_v18  ;;  %v4864_v47 = vpop.eup %4863 }
 0x8ad   : > { %4257 = vmatmul.mubr.msk.f32.vlgmr.msra.gmra.mrb[36].mxu1 %vm978_vm3, %v6022_v34  ;;  %v3103_v39 = vpop.permute.xlu1 %3102  ;;  %v4866_v15 = vpop.eup %4865 }
 0x8ae   : > { %4494 = vmatpush3.bf16.msra.mxu1 %v4491_v5  ;;  %4281 = vmatprep.mubr.msk.f32.mxu1 %vm407_vm0, %v4862_v14  ;;  %v4868_v0 = vpop.eup %4867 }
 0x8af   : > { %4496 = vmatprep.subr.bf16.mxu1 %v4495_v41 }
 0x8b2   : > { %4498 = vmatpush3.bf16.msra.mxu1 %v4495_v41  ;;  %v2104_v41 = vsel %vm407_vm0, %v5910_v58, 0.0  ;;  %v2110_v58 = vsel %vm407_vm0, %v5920_v29, 0.0  ;;  %v2336_v29 = vsel %vm978_vm3, %v6012_v23, 0.0 }
 0x8b3   : > { %4501 = vmatprep.subr.msk.bf16.mxu1 %vm5568_vm2, %v4499_v45  ;;  %4306 = vmatmul.mubr.msk.f32.vlgmr.msra.gmra.mrb[22].mxu0 %vm626_vm1, %v3103_v39  ;;  %v1863_v39 = vsel %vm978_vm3, %v5889_v48, 0.0 }
 0x8b5   : > { %4282 = vmatmul.mubr.msk.f32.vlgmr.msra.gmra.mrb[38].mxu1 %vm407_vm0, %v4864_v47 }
 0x8b6   : > { %4284 = vmatprep.mubr.msk.f32.mxu1 %vm407_vm0, %v4866_v15 }
 0x8b9   : > { %4285 = vmatmul.mubr.msk.f32.gmra.mrb[40].mxu1 %vm407_vm0, %v4868_v0 }
 0x8ba   : > { %4291 = vmatprep.mubr.msk.f32.mxu1 %vm626_vm1, %v6000_v25 }
 0x8bb   : > { %4504 = vmatpush3.bf16.xpose.msk.msra.mxu1 %vm5568_vm2, %v4499_v45  ;;  %v2780_v45 = vsel %vm407_vm0, %v4868_v0, 0.0 }
 0x8c2   : > { %4292 = vmatmul.mubr.msk.f32.vlgmr.msra.gmra.mrb[42].mxu1 %vm626_vm1, %v2903_v6  ;;  %v1431_v6 = vsel %vm407_vm0, %v5755_v46, 0.0  ;;  %v1437_v46 = vsel %vm407_vm0, %v5769_v4, 0.0  ;;  %v1663_v4 = vsel %vm978_vm3, %v5873_v21, 0.0  ;;  %v1866_v21 = vsel %vm978_vm3, %v5896_v50, 0.0 }
 0x97c   : > { %v6040_v51 = vpop.f32.mrb[34].mxu1 }
 0x97d   : > { %v6042_v57 = vpop.f32.mrb[35].mxu1 }
 0x980   : > { %v6044_v2 = vpop.f32.mrb[36].mxu1 }
 0x981   : > { %v6046_v37 = vpop.f32.mrb[37].mxu1 }
 0x986   : > { %v6048_v60 = vpop.f32.mrb[22].mxu0 }
 0x987   : > { %v3182_v59 = vpop.f32.mrb[23].mxu0  ;;  %v3194_v7 = vsel %vm978_vm3, %v6048_v60, -inf }
 0x988   : > { %v6050_v49 = vpop.f32.mrb[38].mxu1  ;;  %v3191_v25 = vsel %vm978_vm3, %v3182_v59, -inf }
 0x989   : > { %3192 = vmax.xlane.f32.xlu0 %v3191_v25  ;;  %v6053_v43 = vpop.f32.mrb[39].mxu1 }
 0x98c   : > { %v6055_v26 = vpop.f32.mrb[40].mxu1 }
 0x98d   : > { %3195 = vmax.xlane.f32.xlu0 %v3194_v7  ;;  %v6059_v18 = vpop.f32.mrb[41].mxu1 }
 0x995   : > { %v4293_v5 = vpop.f32.mrb[42].mxu1 }
 0x996   : > { %v2982_v12 = vpop.f32.mrb[43].mxu1  ;;  %v2994_v62 = vsel %vm978_vm3, %v4293_v5, -inf }
 0x997   : > { %2995 = vmax.xlane.f32.xlu1 %v2994_v62  ;;  %v2991_v1 = vsel %vm978_vm3, %v2982_v12, -inf }
 0x998   : > { %2992 = vmax.xlane.f32.xlu0 %v2991_v1 }
 0x9a8   : > { %4804 = vrot.lane.b32.xlu1 %v5554_v33, %s5209_s16  ;;  %v2771_v33 = vsel %vm407_vm0, %v4862_v14, 0.0  ;;  %v2777_v14 = vsel %vm407_vm0, %v4866_v15, 0.0 }
 0x9ae   : > { %4809 = vrot.lane.b32.xlu0 %v5563_v36, %s5209_s16  ;;  %v2774_v36 = vsel %vm407_vm0, %v4864_v47, 0.0  ;;  %s5213_s16 = smov [#allocation13]  }
 0x9cc   : > { %1432 = vadd.xlane.f32.xlu1 %v1431_v6 }
 0x9cd   : > { %1435 = vadd.xlane.f32.xlu0 %v1434_v9 }
 0x9d0   : > { %2102 = vadd.xlane.f32.xlu1 %v2101_v31 }
 0x9d1   : > { %2105 = vadd.xlane.f32.xlu0 %v2104_v41 }
 0x9d4   : > { %2772 = vadd.xlane.f32.xlu1 %v2771_v33 }
 0x9d5   : > { %2775 = vadd.xlane.f32.xlu0 %v2774_v36 }
 0x9d8   : > { %1438 = vadd.xlane.f32.xlu1 %v1437_v46 }
 0x9d9   : > { %1441 = vadd.xlane.f32.xlu0 %v1440_v35  ;;  %v762_v35 = vsel %vm407_vm0, %v5646_v54, 0.0 }
 0x9dc   : > { %2108 = vadd.xlane.f32.xlu1 %v2107_v11 }
 0x9dd   : > { %2111 = vadd.xlane.f32.xlu0 %v2110_v58 }
 0x9e0   : > { %2778 = vadd.xlane.f32.xlu1 %v2777_v14 }
 0x9e1   : > { %2781 = vadd.xlane.f32.xlu0 %v2780_v45 }
 0x9e4   : > { %1664 = vadd.xlane.f32.xlu1 %v1663_v4  ;;  %v991_v4 = vsel %vm978_vm3, %v5738_v13, 0.0  ;;  %v1196_v13 = vsel %vm978_vm3, %v5753_v44, 0.0 }
 0x9e5   : > { %1667 = vadd.xlane.f32.xlu0 %v1666_v8  ;;  %v759_v8 = vsel %vm407_vm0, %v5642_v52, 0.0 }
 0x9e8   : > { %2334 = vadd.xlane.f32.xlu1 %v2333_v16  ;;  %v1193_v16 = vsel %vm978_vm3, %v5744_v38, 0.0  ;;  %v399_v38 = vld [vmem:[#allocation11 + $0x28] sm:$0xff] }
 0x9e9   : > { %2337 = vadd.xlane.f32.xlu0 %v2336_v29  ;;  %v765_v29 = vsel %vm407_vm0, %v5657_v56, 0.0 }
 0x9ec   : > { %1864 = vadd.xlane.f32.xlu1 %v1863_v39  ;;  %v994_v39 = vsel %vm978_vm3, %v5740_v32, 0.0  ;;  %v400_v32 = vld [vmem:[#allocation11 + $0x30] sm:$0xff] }
 0x9ed   : > { %1867 = vadd.xlane.f32.xlu0 %v1866_v21 }
 0x9f0   : > { %2534 = vadd.xlane.f32.xlu1 %v2533_v3 }
 0x9f1   : > { %2537 = vadd.xlane.f32.xlu0 %v2536_v63  ;;  %v398_v63 = vld [vmem:[#allocation11 + $0x20] sm:$0xff] }
 0xa16   : > { %v3193_v47 = vpop.xlane.xlu0 %3192 }
 0xa17   : > { %v3197_v15 = vsub.f32 %v3182_v59, %v3193_v47 }
 0xa19   : > { %v3199_v23 = vmul.f32 1.442695, %v3197_v15  ;;  %v4519_v15 = vpack.c.bf16 %v399_v38, %v398_v63 }
 0xa1a   : > { %v3196_v0 = vpop.xlane.xlu0 %3195 }
 0xa1b   : > { %4869 = vpow2.f32 %v3199_v23  ;;  %v3198_v48 = vsub.f32 %v6048_v60, %v3196_v0  ;;  %v756_v60 = vsel %vm407_vm0, %v5644_v53, 0.0  ;;  %4520 = vmatprep.subr.bf16.mxu0 %v4519_v15  ;;  %v401_v23 = vld [vmem:[#allocation11 + $0x38] sm:$0xff] }
 0xa1c   : > { %4522 = vmatpush3.bf16.msra.mxu0 %v4519_v15  ;;  %v4523_v44 = vpack.c.bf16 %v401_v23, %v400_v32 }
 0xa1d   : > { %v3201_v30 = vmul.f32 1.442695, %v3198_v48 }
 0xa1e   : > { %4524 = vmatprep.subr.bf16.mxu0 %v4523_v44 }
 0xa20   : > { %4526 = vmatpush3.bf16.msra.mxu0 %v4523_v44 }
 0xa24   : > { %v2996_v25 = vpop.xlane.xlu1 %2995 }
 0xa25   : > { %v4870_v7 = vpop.eup %4869  ;;  %v2998_v62 = vsub.f32 %v4293_v5, %v2996_v25  ;;  %v2993_v50 = vpop.xlane.xlu0 %2992 }
 0xa26   : > { %v2997_v1 = vsub.f32 %v2982_v12, %v2993_v50  ;;  %v3203_v6 = vsel %vm978_vm3, %v4870_v7, 0.0 }
 0xa27   : > { %v3001_v9 = vmul.f32 1.442695, %v2998_v62  ;;  %3204 = vadd.xlane.f32.xlu1 %v3203_v6 }
 0xa28   : > { %v2999_v31 = vmul.f32 1.442695, %v2997_v1  ;;  %v4805_v34 = vpop.permute.xlu1 %4804 }
 0xa29   : > { %4871 = vpow2.f32 %v3001_v9  ;;  %v4807_v41 = vunpack.i.h.bf16 %v4805_v34  ;;  %v4806_v59 = vunpack.i.l.bf16 %v4805_v34  ;;  %v4810_v33 = vpop.permute.xlu0 %4809 }
 0xa2a   : > { %4873 = vpow2.f32 %v2999_v31  ;;  %v4812_v36 = vunpack.i.h.bf16 %v4810_v33  ;;  %v4811_v46 = vunpack.i.l.bf16 %v4810_v33 }
 0xa2b   : > { %4875 = vpow2.f32 %v3201_v30  ;;  %v4505_v5 = vpack.c.bf16 %v4807_v41, %v4806_v59  ;;  %757 = vadd.xlane.f32.xlu1 %v756_v60 }
 0xa2c   : > { %v4515_v12 = vpack.c.bf16 %v4812_v36, %v4811_v46 }
 0xa2d   : > { %4506 = vmatprep.subr.bf16.mxu1 %v4505_v5 }
 0xa2e   : > { %4508 = vmatpush3.bf16.msra.mxu1 %v4505_v5 }
 0xa2f   : > { %763 = vadd.xlane.f32.xlu1 %v762_v35  ;;  %4516 = vmatprep.subr.bf16.mxu1 %v4515_v12 }
 0xa33   : > { %v4872_v11 = vpop.eup %4871 }
 0xa34   : > { %v4874_v58 = vpop.eup %4873  ;;  %v3006_v14 = vsel %vm978_vm3, %v4872_v11, 0.0 }
 0xa35   : > { %v4876_v45 = vpop.eup %4875  ;;  %3007 = vadd.xlane.f32.xlu0 %v3006_v14  ;;  %4298 = vmatprep.mubr.msk.f32.mxu1 %vm978_vm3, %v4874_v58  ;;  %v3003_v53 = vsel %vm978_vm3, %v4874_v58, 0.0 }
 0xa36   : > { %4299 = vmatmul.mubr.msk.f32.vlgmr.msra.gmra.mrb[44].mxu1 %vm978_vm3, %v4872_v11  ;;  %3004 = vadd.xlane.f32.xlu1 %v3003_v53  ;;  %v3206_v54 = vsel %vm978_vm3, %v4876_v45, 0.0 }
 0xa37   : > { %4518 = vmatpush3.bf16.msra.mxu1 %v4515_v12  ;;  %4312 = vmatprep.mubr.msk.f32.mxu1 %vm978_vm3, %v4870_v7 }
 0xa39   : > { %3207 = vadd.xlane.f32.xlu0 %v3206_v54 }
 0xa3a   : > { %992 = vadd.xlane.f32.xlu1 %v991_v4  ;;  %4313 = vmatmul.mubr.msk.f32.vlgmr.msra.gmra.mrb[46].mxu1 %vm978_vm3, %v4876_v45 }
 0xa3d   : > { %760 = vadd.xlane.f32.xlu0 %v759_v8 }
 0xa3e   : > { %1194 = vadd.xlane.f32.xlu1 %v1193_v16 }
 0xa41   : > { %766 = vadd.xlane.f32.xlu0 %v765_v29 }
 0xa45   : > { %995 = vadd.xlane.f32.xlu0 %v994_v39 }
 0xa49   : > { %1197 = vadd.xlane.f32.xlu0 %v1196_v13 }
 0xa59   : > { %v1433_v21 = vpop.xlane.xlu1 %1432 }
 0xa5a   : > { %4877 = vrcp.f32 %v1433_v21  ;;  %v1436_v52 = vpop.xlane.xlu0 %1435 }
 0xa5b   : > { %4879 = vrcp.f32 %v1436_v52 }
 0xa5d   : > { %v2103_v3 = vpop.xlane.xlu1 %2102 }
 0xa5e   : > { %4881 = vrcp.f32 %v2103_v3  ;;  %v2106_v47 = vpop.xlane.xlu0 %2105 }
 0xa5f   : > { %4883 = vrcp.f32 %v2106_v47 }
 0xa61   : > { %v2773_v56 = vpop.xlane.xlu1 %2772 }
 0xa62   : > { %4885 = vrcp.f32 %v2773_v56  ;;  %v2776_v0 = vpop.xlane.xlu0 %2775 }
 0xa63   : > { %4887 = vrcp.f32 %v2776_v0 }
 0xa64   : > { %v4878_v48 = vpop.eup %4877 }
 0xa65   : > { %v4880_v25 = vpop.eup %4879  ;;  %v1439_v7 = vpop.xlane.xlu1 %1438  ;;  %v1556_v62 = vmul.f32 %v4878_v48, %v5808_v22 }
 0xa66   : > { %4889 = vrcp.f32 %v1439_v7  ;;  %v1442_v50 = vpop.xlane.xlu0 %1441  ;;  %v1557_v1 = vmul.f32 %v4880_v25, %v5804_v20 }
 0xa67   : > { %3304 = vrot.lane.b32.xlu1 %v1556_v62, %s5210_s11  ;;  %4891 = vrcp.f32 %v1442_v50 }
 0xa68   : > { %v4882_v6 = vpop.eup %4881  ;;  %3306 = vrot.lane.b32.xlu0 %v1557_v1, %s5210_s11  ;;  %v6334_v1 = vld [vmem:[#allocation24_spill] sm:$0xff] }
 0xa69   : > { %v2109_v30 = vpop.xlane.xlu1 %2108  ;;  %v2226_v9 = vmul.f32 %v4882_v6, %v5951_v55  ;;  %v4884_v31 = vpop.eup %4883 }
 0xa6a   : > { %4893 = vrcp.f32 %v2109_v30  ;;  %v2112_v34 = vpop.xlane.xlu0 %2111  ;;  %v2227_v59 = vmul.f32 %v4884_v31, %v5947_v19  ;;  %v6335_v31 = vld [vmem:[#allocation26_spill] sm:$0xff] }
 0xa6b   : > { %3320 = vrot.lane.b32.xlu1 %v2226_v9, %s5211_s8  ;;  %4895 = vrcp.f32 %v2112_v34 }
 0xa6c   : > { %v4886_v22 = vpop.eup %4885 }
 0xa6d   : > { %v2779_v41 = vpop.xlane.xlu1 %2778  ;;  %v2896_v20 = vmul.f32 %v4886_v22, %v6053_v43  ;;  %v4888_v33 = vpop.eup %4887 }
 0xa6e   : > { %4897 = vrcp.f32 %v2779_v41  ;;  %v2782_v36 = vpop.xlane.xlu0 %2781  ;;  %v2897_v5 = vmul.f32 %v4888_v33, %v6050_v49 }
 0xa6f   : > { %3336 = vrot.lane.b32.xlu0 %v2896_v20, %s5212_s28  ;;  %3322 = vrot.lane.b32.xlu1 %v2227_v59, %s5211_s8  ;;  %4899 = vrcp.f32 %v2782_v36  ;;  %v6336_v36 = vld [vmem:[#allocation20_spill] sm:$0xff] }
 0xa70   : > { %v4890_v55 = vpop.eup %4889 }
 0xa71   : > { %v1665_v46 = vpop.xlane.xlu1 %1664  ;;  %v1558_v60 = vmul.f32 %v4890_v55, %v5812_v28  ;;  %v4892_v12 = vpop.eup %4891 }
 0xa72   : > { %4901 = vrcp.f32 %v1665_v46  ;;  %v1668_v43 = vpop.xlane.xlu0 %1667  ;;  %v1559_v58 = vmul.f32 %v4892_v12, %v5810_v24  ;;  %v6337_v46 = vld [vmem:[#allocation23_spill] sm:$0xff] }
 0xa73   : > { %3308 = vrot.lane.b32.xlu0 %v1558_v60, %s5210_s11  ;;  %3338 = vrot.lane.b32.xlu1 %v2897_v5, %s5212_s28  ;;  %4903 = vrcp.f32 %v1668_v43 }
 0xa74   : > { %v4894_v19 = vpop.eup %4893 }
 0xa75   : > { %v2335_v35 = vpop.xlane.xlu1 %2334  ;;  %v2228_v11 = vmul.f32 %v4894_v19, %v5955_v42  ;;  %v4896_v14 = vpop.eup %4895 }
 0xa76   : > { %4905 = vrcp.f32 %v2335_v35  ;;  %v2338_v45 = vpop.xlane.xlu0 %2337  ;;  %v2229_v54 = vmul.f32 %v4896_v14, %v5953_v17 }
 0xa77   : > { %3324 = vrot.lane.b32.xlu0 %v2228_v11, %s5211_s8  ;;  %3310 = vrot.lane.b32.xlu1 %v1559_v58, %s5210_s11  ;;  %4907 = vrcp.f32 %v2338_v45  ;;  %v6338_v58 = vld [vmem:[#allocation19_spill] sm:$0xff] }
 0xa78   : > { %v4898_v28 = vpop.eup %4897 }
 0xa79   : > { %v1865_v49 = vpop.xlane.xlu1 %1864  ;;  %v2898_v53 = vmul.f32 %v4898_v28, %v6059_v18  ;;  %v4900_v4 = vpop.eup %4899  ;;  %v6339_v28 = vld [vmem:[#allocation25_spill] sm:$0xff] }
 0xa7a   : > { %4909 = vrcp.f32 %v1865_v49  ;;  %v1868_v8 = vpop.xlane.xlu0 %1867  ;;  %v2899_v29 = vmul.f32 %v4900_v4, %v6055_v26 }
 0xa7b   : > { %3340 = vrot.lane.b32.xlu0 %v2898_v53, %s5212_s28  ;;  %3326 = vrot.lane.b32.xlu1 %v2229_v54, %s5211_s8  ;;  %4911 = vrcp.f32 %v1868_v8 }
 0xa7c   : > { %v4902_v24 = vpop.eup %4901 }
 0xa7d   : > { %v2535_v42 = vpop.xlane.xlu1 %2534  ;;  %v1758_v16 = vmul.f32 %v4902_v24, %v5935_v40  ;;  %v4904_v39 = vpop.eup %4903 }
 0xa7e   : > { %4913 = vrcp.f32 %v2535_v42  ;;  %v2538_v13 = vpop.xlane.xlu0 %2537  ;;  %v1759_v21 = vmul.f32 %v4904_v39, %v5933_v61  ;;  %v6340_v39 = vld [vmem:[#allocation22_spill] sm:$0xff] }
 0xa7f   : > { %3365 = vrot.lane.b32.xlu0 %v1758_v16, %s5210_s11  ;;  %3342 = vrot.lane.b32.xlu1 %v2899_v29, %s5212_s28  ;;  %4915 = vrcp.f32 %v2538_v13 }
 0xa80   : > { %v4906_v17 = vpop.eup %4905 }
 0xa81   : > { %v2428_v18 = vmul.f32 %v4906_v17, %v6042_v57  ;;  %v4908_v52 = vpop.eup %4907 }
 0xa82   : > { %v2429_v3 = vmul.f32 %v4908_v52, %v6040_v51  ;;  %v395_v51 = vld [vmem:[#allocation11 + $0x8] sm:$0xff] }
 0xa83   : > { %3381 = vrot.lane.b32.xlu0 %v2428_v18, %s5211_s8  ;;  %3367 = vrot.lane.b32.xlu1 %v1759_v21, %s5210_s11 }
 0xa84   : > { %v4910_v40 = vpop.eup %4909 }
 0xa85   : > { %v1958_v26 = vmul.f32 %v4910_v40, %v5939_v27  ;;  %v4912_v63 = vpop.eup %4911  ;;  %v394_v27 = vld [vmem:[#allocation11] sm:$0xff] }
 0xa86   : > { %v1959_v61 = vmul.f32 %v4912_v63, %v5937_v10  ;;  %v4527_v56 = vpack.c.bf16 %v395_v51, %v394_v27  ;;  %v397_v27 = vld [vmem:[#allocation11 + $0x18] sm:$0xff] }
 0xa87   : > { %3369 = vrot.lane.b32.xlu0 %v1958_v26, %s5210_s11  ;;  %3383 = vrot.lane.b32.xlu1 %v2429_v3, %s5211_s8  ;;  %v6341_v26 = vld [vmem:[#allocation21_spill] sm:$0xff] }
 0xa88   : > { %v4914_v38 = vpop.eup %4913  ;;  %4528 = vmatprep.subr.bf16.mxu0 %v4527_v56 }
 0xa89   : > { %v2628_v57 = vmul.f32 %v4914_v38, %v6046_v37  ;;  %v4916_v47 = vpop.eup %4915 }
 0xa8a   : > { %v2629_v15 = vmul.f32 %v4916_v47, %v6044_v2 }
 0xa8b   : > { %3385 = vrot.lane.b32.xlu0 %v2628_v57, %s5211_s8  ;;  %3371 = vrot.lane.b32.xlu1 %v1959_v61, %s5210_s11 }
 0xa8f   : > { %3387 = vrot.lane.b32.xlu1 %v2629_v15, %s5211_s8  ;;  %v396_v15 = vld [vmem:[#allocation11 + $0x10] sm:$0xff]  ;;  %s5115_s8 = sshll.u32 %s5213_s16, 4  ;;  %s5116_s8 = int_to_ptr.vmem [resolvable:$false] %s5115_s8 }
 0xa90   : > { %v4531_v51 = vpack.c.bf16 %v397_v27, %v396_v15  ;;  %p5118_p13 = scmp.lt.s32.totalorder %s6244_s22, %s5116_s8 }
 0xab4   : > { %v6168_v32 = vpop.xlane.xlu1 %3204 }
 0xab8   : > { %v758_v23 = vpop.xlane.xlu1 %757 }
 0xabc   : > { %v764_v0 = vpop.xlane.xlu1 %763 }
 0xac2   : > { %v6170_v37 = vpop.xlane.xlu0 %3007 }
 0xac3   : > { %v6172_v10 = vpop.xlane.xlu1 %3004 }
 0xac6   : > { %v6174_v44 = vpop.xlane.xlu0 %3207 }
 0xac7   : > { %v993_v48 = vpop.xlane.xlu1 %992 }
 0xac8   : > { %4917 = vrcp.f32 %v993_v48 }
 0xaca   : > { %v761_v25 = vpop.xlane.xlu0 %760 }
 0xacb   : > { %v1195_v2 = vpop.xlane.xlu1 %1194 }
 0xacc   : > { %4919 = vrcp.f32 %v1195_v2 }
 0xacd   : > { %4921 = vrcp.f32 %v758_v23 }
 0xace   : > { %v767_v7 = vpop.xlane.xlu0 %766 }
 0xad2   : > { %v4918_v62 = vpop.eup %4917  ;;  %v996_v50 = vpop.xlane.xlu0 %995 }
 0xad3   : > { %4923 = vrcp.f32 %v996_v50  ;;  %v6177_v6 = vmul.f32 %v4918_v62, %v6334_v1 }
 0xad4   : > { %4925 = vrcp.f32 %v761_v25 }
 0xad6   : > { %v4920_v30 = vpop.eup %4919  ;;  %v1198_v9 = vpop.xlane.xlu0 %1197 }
 0xad7   : > { %4927 = vrcp.f32 %v1198_v9  ;;  %v6180_v34 = vmul.f32 %v4920_v30, %v6335_v31  ;;  %v4922_v41 = vpop.eup %4921 }
 0xad8   : > { %4929 = vrcp.f32 %v764_v0  ;;  %v881_v55 = vmul.f32 %v4922_v41, %v6336_v36 }
 0xad9   : > { %v3305_v22 = vpop.permute.xlu1 %3304  ;;  %4931 = vrcp.f32 %v767_v7 }
 0xada   : > { %v3307_v59 = vpop.permute.xlu0 %3306  ;;  %v3348_v12 = vsel %vm626_vm1, %v881_v55, %v3305_v22  ;;  %4933 = vrcp.f32 %v6170_v37 }
 0xadb   : > { %4935 = vrcp.f32 %v6172_v10 }
 0xadc   : > { %4937 = vrcp.f32 %v6174_v44 }
 0xadd   : > { %v4924_v20 = vpop.eup %4923  ;;  %v3321_v33 = vpop.permute.xlu1 %3320  ;;  %4939 = vrcp.f32 %v6168_v32 }
 0xade   : > { %v6184_v60 = vmul.f32 %v4924_v20, %v6337_v46  ;;  %v4926_v5 = vpop.eup %4925  ;;  %v3352_v19 = vsel %vm978_vm3, %v3348_v12, %v3321_v33 }
 0xadf   : > { %v882_v14 = vmul.f32 %v4926_v5, %v6338_v58 }
 0xae1   : > { %v4928_v43 = vpop.eup %4927  ;;  %v3323_v35 = vpop.permute.xlu1 %3322  ;;  %v3349_v53 = vsel %vm626_vm1, %v882_v14, %v3307_v59 }
 0xae2   : > { %v3337_v11 = vpop.permute.xlu0 %3336  ;;  %v6191_v49 = vmul.f32 %v4928_v43, %v6339_v28  ;;  %v3353_v54 = vsel %vm978_vm3, %v3349_v53, %v3323_v35  ;;  %v4930_v42 = vpop.eup %4929 }
 0xae3   : > { %v3357_v45 = vsel %vm3356_vm4, %v3352_v19, %v3337_v11  ;;  %v883_v13 = vmul.f32 %v4930_v42, %v6340_v39  ;;  %v4932_v17 = vpop.eup %4931 }
 0xae4   : > { %4323 = vmatprep.mubr.msk.f32.mxu0 %vm407_vm0, %v3357_v45  ;;  %v884_v3 = vmul.f32 %v4932_v17, %v6341_v26 }
 0xae5   : > { %v3339_v4 = vpop.permute.xlu1 %3338 }
 0xae6   : > { %v3309_v8 = vpop.permute.xlu0 %3308  ;;  %v3358_v24 = vsel %vm3356_vm4, %v3353_v54, %v3339_v4 }
 0xae7   : > { %4324 = vmatmul.mubr.msk.f32.vlgmr.msra.gmra.mrb[24].mxu0 %vm407_vm0, %v3358_v24  ;;  %v3350_v18 = vsel %vm626_vm1, %v883_v13, %v3309_v8 }
 0xae8   : > { %4530 = vmatpush3.bf16.msra.mxu0 %v4527_v56  ;;  %v4934_v56 = vpop.eup %4933 }
 0xae9   : > { %v3311_v16 = vpop.permute.xlu1 %3310  ;;  %4532 = vmatprep.subr.bf16.mxu0 %v4531_v51  ;;  %v4936_v0 = vpop.eup %4935 }
 0xaea   : > { %v3325_v29 = vpop.permute.xlu0 %3324  ;;  %v3351_v38 = vsel %vm626_vm1, %v884_v3, %v3311_v16  ;;  %v4938_v7 = vpop.eup %4937 }
 0xaeb   : > { %v3354_v21 = vsel %vm978_vm3, %v3350_v18, %v3325_v29  ;;  %v4940_v62 = vpop.eup %4939 }
 0xaec   : > { %4534 = vmatpush3.bf16.msra.mxu0 %v4531_v51 }
 0xaed   : > { %v3327_v52 = vpop.permute.xlu1 %3326 }
 0xaee   : > { %v3341_v40 = vpop.permute.xlu0 %3340  ;;  %v3355_v57 = vsel %vm978_vm3, %v3351_v38, %v3327_v52 }
 0xaef   : > { %v3359_v63 = vsel %vm3356_vm4, %v3354_v21, %v3341_v40 }
 0xaf0   : > { %4326 = vmatprep.mubr.msk.f32.mxu0 %vm407_vm0, %v3359_v63 }
 0xaf1   : > { %v3343_v61 = vpop.permute.xlu1 %3342 }
 0xaf2   : > { %v3360_v47 = vsel %vm3356_vm4, %v3355_v57, %v3343_v61  ;;  %v3366_v44 = vpop.permute.xlu0 %3365 }
 0xaf3   : > { %4327 = vmatmul.mubr.msk.f32.gmra.mrb[26].mxu0 %vm407_vm0, %v3360_v47  ;;  %v3409_v59 = vsel %vm626_vm1, %v6177_v6, %v3366_v44 }
 0xaf5   : > { %v3368_v32 = vpop.permute.xlu1 %3367 }
 0xaf6   : > { %v3382_v9 = vpop.permute.xlu0 %3381  ;;  %v3410_v36 = vsel %vm626_vm1, %v6184_v60, %v3368_v32 }
 0xaf7   : > { %v3413_v55 = vsel %vm978_vm3, %v3409_v59, %v3382_v9 }
 0xaf9   : > { %v3384_v30 = vpop.permute.xlu1 %3383 }
 0xafa   : > { %v3370_v22 = vpop.permute.xlu0 %3369  ;;  %v3414_v5 = vsel %vm978_vm3, %v3410_v36, %v3384_v30 }
 0xafb   : > { %v3411_v19 = vsel %vm626_vm1, %v6180_v34, %v3370_v22  ;;  %v3895_v34 = vld [vmem:[%s6302_s6] ss:$0 sm:$0xff] }
 0xafd   : > { %v3372_v31 = vpop.permute.xlu1 %3371 }
 0xafe   : > { %v3386_v20 = vpop.permute.xlu0 %3385  ;;  %v3412_v60 = vsel %vm626_vm1, %v6191_v49, %v3372_v31 }
 0xaff   : > { %v3415_v35 = vsel %vm978_vm3, %v3411_v19, %v3386_v20 }
 0xb01   : > { %v3388_v41 = vpop.permute.xlu1 %3387 }
 0xb02   : > { %v3416_v58 = vsel %vm978_vm3, %v3412_v60, %v3388_v41 }
 0xb09   : > { %v4300_v23 = vpop.f32.mrb[44].mxu1 }
 0xb0a   : > { %v3099_v48 = vmul.f32 %v4934_v56, %v4300_v23  ;;  %v3087_v25 = vpop.f32.mrb[45].mxu1 }
 0xb0b   : > { %v3098_v2 = vmul.f32 %v4936_v0, %v3087_v25 }
 0xb0c   : > { %3399 = vrot.lane.b32.xlu1 %v3099_v48, %s5212_s28 }
 0xb0d   : > { %3397 = vrot.lane.b32.xlu0 %v3098_v2, %s5212_s28  ;;  %v4314_v37 = vpop.f32.mrb[46].mxu1 }
 0xb0e   : > { %v3299_v50 = vmul.f32 %v4938_v7, %v4314_v37  ;;  %v3287_v10 = vpop.f32.mrb[47].mxu1 }
 0xb0f   : > { %v3298_v1 = vmul.f32 %v4940_v62, %v3287_v10 }
 0xb10   : > { %3403 = vrot.lane.b32.xlu1 %v3299_v50, %s5212_s28 }
 0xb11   : > { %3401 = vrot.lane.b32.xlu0 %v3298_v1, %s5212_s28  ;;  %s5117_s28 = scalar_lea.vmem %s5116_s8, 1024 }
 0xb12   : > { %p5119_p0 = scmp.lt.s32.totalorder %s5117_s28, %s5111_s23 }
 0xb14   : > { %p5120_p2 = por %p5119_p0, %p5118_p13 }
 0xb16   : > { %p5121_p8 = pnand %p5120_p2, %p5114_p1 }
 0xb7e   : > { %v3400_v33 = vpop.permute.xlu1 %3399 }
 0xb7f   : > { %v3398_v46 = vpop.permute.xlu0 %3397  ;;  %v3418_v43 = vsel %vm3356_vm4, %v3414_v5, %v3400_v33 }
 0xb80   : > { %v3417_v12 = vsel %vm3356_vm4, %v3413_v55, %v3398_v46 }
 0xb81   : > { %4337 = vmatprep.mubr.msk.f32.mxu0 %vm407_vm0, %v3417_v12 }
 0xb82   : > { %4338 = vmatmul.mubr.msk.f32.vlgmr.msra.gmra.mrb[24].mxu0 %vm407_vm0, %v3418_v43  ;;  %v3404_v6 = vpop.permute.xlu1 %3403 }
 0xb83   : > { %v3402_v11 = vpop.permute.xlu0 %3401  ;;  %v3420_v45 = vsel %vm3356_vm4, %v3416_v58, %v3404_v6 }
 0xb84   : > { %v3419_v14 = vsel %vm3356_vm4, %v3415_v35, %v3402_v11 }
 0xb85   : > { %4340 = vmatprep.mubr.msk.f32.mxu0 %vm407_vm0, %v3419_v14 }
 0xb86   : > { %4341 = vmatmul.mubr.msk.f32.gmra.mrb[26].mxu0 %vm407_vm0, %v3420_v45 }
 0xc55   : > { %v4339_v28 = vpop.f32.mrb[24].mxu0 }
 0xc56   : > { %v3622_v49 = vadd.f32 %v4339_v28, %v3895_v34  ;;  %v3596_v53 = vpop.f32.mrb[25].mxu0 }
 0xc57   : > { %v3621_v54 = vadd.f32 %v3895_v34, %v3596_v53 }
 0xc58   : > { %3626 = vst.msk [vmem:[%s369_s29 + $0x8] sm:$0xff] %vm407_vm0, %v3622_v49 }
 0xc59   : > { %3625 = vst.msk [vmem:[%s369_s29] sm:$0xff] %vm407_vm0, %v3621_v54  ;;  %v4342_v4 = vpop.f32.mrb[26].mxu0 }
 0xc5a   : > { %v3624_v8 = vadd.f32 %v4342_v4, %v3895_v34  ;;  %v3606_v24 = vpop.f32.mrb[27].mxu0 }
 0xc5b   : > { %v3623_v42 = vadd.f32 %v3895_v34, %v3606_v24 }
 0xc5c   : > { %3628 = vst.msk [vmem:[%s369_s29 + $0x18] sm:$0xff] %vm407_vm0, %v3624_v8 }
 0xc5d   : > { %3627 = vst.msk [vmem:[%s369_s29 + $0x10] sm:$0xff] %vm407_vm0, %v3623_v42 }
 0xc5e   : > { %5124 = shalt.err (!%p5121_p8)
}
 0xc5f   : > { %s5125_s15 = scalar_lea.hbm %s6249_s13, 512  ;;  %s5129_s18 = scalar_lea.hbm %s6303_s7, 1024 }
 0xc60   : > { %p5126_p6 = scmp.ne.s32.totalorder %s6249_s13, %s5125_s15  ;;  %p5130_p3 = scmp.lt.u32.totalorder %s6249_s13, %s6303_s7 }
 0xc61   : > { %p5131_p5 = scmp.lt.u32.totalorder %s5129_s18, %s5125_s15  ;;  %p5133_p7 = scmp.lt.u32.totalorder %s5125_s15, %s6249_s13 }
 0xc62   : > { %p5127_p10 = pnand %p5126_p6, %p6342_p4 }
 0xc63   : > { %p5132_p9 = por %p5131_p5, %p5130_p3 }
 0xc64   : > { %p5128_p11 = pneg %p5127_p10 }
 0xc65   : > { %p5134_p12 = por %p5133_p7, %p5132_p9 }
 0xc67   : > { %p5135_p1 = pnand %p5134_p12, %p5128_p11 }
 0xc69   : > { %5138 = shalt.err (!%p5135_p1)
}
 0xc6a   : > { %s5214_s23 = smov 128  }
 0xc6b   : > { %4561 = dma.vmem_to_hbm [thread:$0]  (%p6342_p4), %s6244_s22, 512, %s6249_s13, %s3630_s30, %s5214_s23, %s5214_s23, %s5210_s11  }
 0xc6c PF: > { %s3658_s16 = sand.u32 1, %s5177_s24   ;;  %p6343_p13 = scmp.ne.s32.totalorder %s6314_s17, 0 }
 0xc6d   : > { %p6344_p0 = scmp.ge.s32.totalorder %s5189_s27, 2  ;;  %s3659_s8 = scalar_lea.sflag [#allocation4], %s3658_s16 }
 0xc6f   : > { %p4584_p2 = pnand %p6344_p0, %p6343_p13 }
 0xc71   : > { %5172 = dma.done.wait (!%p4584_p2), %s3659_s8, 512  }
 0xc72   : > { %5174 = vsyncadd (!%p4584_p2), %s3659_s8, 4294966784  ;;  %p23_p8 = scmp.ge.s32.totalorder %s5428_s19, 4   ;;  %s6345_s24 = smov %s5181_s25 }
 0xc73   : > { %s6346_s25 = smov %s5185_s26  ;;  %s6347_s26 = smov %s5440_s12 }
 0xc74   : > { %s6348_s27 = smov %s5428_s19  ;;  %25 = sbr.rel (!%p23_p8) target bundleno = 8 (0x8), region = 113 }
 0xc7b   :  { %3664 = vsyncpa [#allocation3], 1 }
 0xc7c   :  { %3666 = vsyncpa [#allocation3 + $0x1], 1 }
 0xc7d   :  { %3667 = vsyncpa [#allocation6], 1 }
 0xc7e   :  { %3668 = vsyncpa [#allocation9], 1 }
 0xc7f   :  { %3669 = vsyncpa [#allocation12], 1 }
 0xc80   :  { %3670 = vsyncpa [#allocation4], 1 }
 0xc81   :  { %3672 = vsyncpa [#allocation4 + $0x1], 1 }

</bundles_post_ra>
